<compile_context>
chip_gen: v7x
topology: tpu7x:2x2x1
jax: 0.10.0
libtpu: 0.0.40
codegen_flags: <defaults>
</compile_context>

<pallas_src>
import functools

import jax
import jax.numpy as jnp
from jax import lax
from jax.experimental import pallas as pl
from jax.experimental.pallas import tpu as pltpu

LEAKY_SLOPE = 0.01
BN_EPS = 1e-5


def _leaky(x):
    return jnp.where(x > 0, x, LEAKY_SLOPE * x)


# ---------------------------------------------------------------------------
# Fused resnet-block-stack kernel
# ---------------------------------------------------------------------------
def _make_block_stack_kernel(metas, seq_len, clip_value, dot_dtype):
    """Builds the fused kernel.  Ref order: (x_ref, *weight_refs, o_ref).

    metas: tuple of (has_downsample, c_out, c_med) per block (static).
    Per-block weight refs:
      has_ds:  ds_w (Cin,Cout), w1 (Cin,Cmed), w2 (3,Cmed,Cmed), w3 (Cmed,Cout), shifts (4,Cpad)
      no ds:   w1, w2, w3, shifts
    shifts rows: 0 = downsample bias (or 0), 1 = t1, 2 = t2, 3 = t3 (zero-padded to Cpad lanes).
    """

    def kernel(*refs):
        x_ref = refs[0]
        o_ref = refs[-1]
        wrefs = refs[1:-1]

        h = x_ref[...].astype(jnp.float32)          # (R, C_in), f32 working precision
        rows = h.shape[0]

        # Hoisted once per grid step: boundary masks for the k=3 "same" conv.
        # Rows hold tb sequences of seq_len each; masks kill cross-sequence neighbours.
        pos = lax.broadcasted_iota(jnp.int32, (rows, 1), 0) % seq_len
        not_first = pos != 0                        # row has a valid l-1 neighbour
        not_last = pos != (seq_len - 1)             # row has a valid l+1 neighbour

        widx = 0
        for has_ds, c_out, c_med in metas:
            if has_ds:
                ds_w, w1, w2, sh_w3, sh = wrefs[widx], wrefs[widx + 1], wrefs[widx + 2], wrefs[widx + 3], wrefs[widx + 4]
                w3 = sh_w3
                widx += 5
            else:
                ds_w = None
                w1, w2, w3, sh = wrefs[widx], wrefs[widx + 1], wrefs[widx + 2], wrefs[widx + 3]
                widx += 4

            h_lo = h.astype(dot_dtype)

            # residual / downsample path (two separate dots; no column split)
            if has_ds:
                ds_b = sh[0:1, :c_out]
                x1 = jnp.dot(h_lo, ds_w[...],
                             preferred_element_type=jnp.float32) + ds_b
            else:
                x1 = h
            x1 = jnp.clip(x1, -clip_value, clip_value)

            t1 = sh[1:2, :c_med]
            t2 = sh[2:3, :c_med]
            t3 = sh[3:4, :c_out]

            # conv1 (1x1) + folded BN + leaky
            a = _leaky(jnp.dot(h_lo, w1[...],
                               preferred_element_type=jnp.float32) + t1)

            # conv2 (k=3, "same"): neighbours via XLU roll + boundary masks;
            # three accumulating dots (no lane-axis concat).
            a_m1 = jnp.where(not_first, pltpu.roll(a, shift=1, axis=0), 0.0)
            a_p1 = jnp.where(not_last, pltpu.roll(a, shift=rows - 1, axis=0), 0.0)
            g = jnp.dot(a_m1.astype(dot_dtype), w2[0],
                        preferred_element_type=jnp.float32)
            g = g + jnp.dot(a.astype(dot_dtype), w2[1],
                            preferred_element_type=jnp.float32)
            g = g + jnp.dot(a_p1.astype(dot_dtype), w2[2],
                            preferred_element_type=jnp.float32)
            g = _leaky(g + t2)

            # conv3 (1x1) + folded BN + leaky, then residual add
            z = _leaky(jnp.dot(g.astype(dot_dtype), w3[...],
                               preferred_element_type=jnp.float32) + t3)
            h = x1 + z                               # f32

        o_ref[...] = h.astype(o_ref.dtype)

    return kernel


def _rep_spec(shape):
    nd = len(shape)

    def idx(i, _nd=nd):
        return (0,) * _nd

    return pl.BlockSpec(tuple(shape), idx)


def _pick_batch_tile(n, seq_len, row_align, max_rows=512, want_grid=4):
    """Largest batch tile (in sequences) dividing n with sublane-aligned row blocks,
    rows <= max_rows, and >= want_grid grid steps when possible (>= 2 per v7x core)."""
    for min_grid in range(min(want_grid, n), 0, -1):
        best = None
        for tb in range(1, n + 1):
            if n % tb:
                continue
            if n // tb < min_grid:
                continue
            rows = tb * seq_len
            if rows > max_rows and tb != 1:
                continue
            if rows % row_align and tb != n:
                continue
            best = tb
        if best is not None:
            return best
    return n


def block_stack(x2d, block_weights, metas, seq_len, clip_value, dot_dtype):
    """x2d: (N*L, C_in) -> (N*L, C_out); the whole block stack in one kernel."""
    total_rows, c_in = x2d.shape
    n = total_rows // seq_len
    c_out = metas[-1][1]
    itemsize = jnp.dtype(dot_dtype).itemsize
    row_align = 8 if itemsize >= 4 else 32 // itemsize        # 16 for bf16
    tb = _pick_batch_tile(n, seq_len, row_align)
    rows = tb * seq_len

    # Conservative VMEM budget: double-buffered weights + in/out blocks + f32 intermediates.
    weight_bytes = sum(int(w.size) * w.dtype.itemsize for w in block_weights)
    c_out_max = max(m[1] for m in metas)
    c_med_max = max(m[2] for m in metas)
    act_bytes = rows * (c_in + 3 * c_out_max + 4 * c_med_max) * 4
    est = 2 * weight_bytes + 2 * rows * (c_in + c_out) * itemsize + 2 * act_bytes + (4 << 20)
    vmem_limit = int(min(max(est, 32 << 20), 64 << 20))       # never below default, <= v7x physical

    kernel = _make_block_stack_kernel(metas, seq_len, clip_value, dot_dtype)
    return pl.pallas_call(
        kernel,
        out_shape=jax.ShapeDtypeStruct((total_rows, c_out), dot_dtype),
        grid=(n // tb,),
        in_specs=[pl.BlockSpec((rows, c_in), lambda i: (i, 0))]
                 + [_rep_spec(w.shape) for w in block_weights],
        out_specs=pl.BlockSpec((rows, c_out), lambda i: (i, 0)),
        compiler_params=pltpu.CompilerParams(
            dimension_semantics=("parallel",),
            vmem_limit_bytes=vmem_limit),
    )(x2d, *block_weights)


# ---------------------------------------------------------------------------
# fc_out: tiled matmul with K-reduction grid axis + VMEM accumulator
# ---------------------------------------------------------------------------
def _fc_matmul_kernel(y_ref, w_ref, b_ref, o_ref, acc_ref):
    @pl.when(pl.program_id(2) == 0)
    def _():
        acc_ref[...] = jnp.zeros_like(acc_ref)

    acc_ref[...] += jnp.dot(y_ref[...], w_ref[...],
                            preferred_element_type=jnp.float32)

    @pl.when(pl.program_id(2) == pl.num_programs(2) - 1)
    def _():
        o_ref[...] = (acc_ref[...] + b_ref[...]).astype(o_ref.dtype)


def _pick_tile(dim, align, max_tile=512):
    """Largest aligned divisor of dim that is <= max_tile; full dim if dim <= max_tile
    or no legal divisor exists (full-extent blocks are always (8,128)-legal)."""
    if dim <= max_tile:
        return dim
    t = (max_tile // align) * align
    while t >= align:
        if dim % t == 0:
            return t
        t -= align
    return dim


def fc_out(y2d, w, b):
    """(M, K) x (K, O) + b -> (M, O) float32, K tiled as a reduction axis."""
    m, k = y2d.shape
    _, o = w.shape
    tm = _pick_tile(m, align=8)
    tn = _pick_tile(o, align=128)
    tk = _pick_tile(k, align=128)
    return pl.pallas_call(
        _fc_matmul_kernel,
        out_shape=jax.ShapeDtypeStruct((m, o), jnp.float32),
        grid=(m // tm, o // tn, k // tk),
        in_specs=[pl.BlockSpec((tm, tk), lambda i, j, kk: (i, kk)),
                  pl.BlockSpec((tk, tn), lambda i, j, kk: (kk, j)),
                  pl.BlockSpec((1, tn), lambda i, j, kk: (0, j))],
        out_specs=pl.BlockSpec((tm, tn), lambda i, j, kk: (i, j)),
        scratch_shapes=[pltpu.VMEM((tm, tn), jnp.float32)],
        compiler_params=pltpu.CompilerParams(
            dimension_semantics=("parallel", "parallel", "arbitrary")),
    )(y2d, w, b)


# ---------------------------------------------------------------------------
# Top-level forward
# ---------------------------------------------------------------------------
@functools.partial(jax.jit, static_argnames=("metas", "clip_value", "dot_dtype"))
def mod_resnet_1d_forward(x, block_weights, fc_w, fc_b, *, metas,
                          clip_value, dot_dtype=jnp.bfloat16):
    """x: (B0, B1, seq_len, feat_len) -> (B0, B1, dim_out)."""
    b0, b1, seq_len, feat_len = x.shape
    n = b0 * b1
    # torch: reshape(-1, L, F).permute(0, 2, 1) -> NCL.  Our kernels use the
    # (rows=N*L, channels) layout (same data, channels on lanes) - free reshape.
    x2d = x.reshape(n * seq_len, feat_len).astype(dot_dtype)
    h2d = block_stack(x2d, block_weights, metas, seq_len, clip_value, dot_dtype)
    c_out = h2d.shape[-1]
    y2d = h2d.reshape(n, seq_len * c_out)            # free: same HBM layout
    out = fc_out(y2d, fc_w, fc_b)
    return out.reshape(b0, b1, -1)


# ---------------------------------------------------------------------------
# Parameter construction (torch-layout raw params) and packing for the kernels
# ---------------------------------------------------------------------------
def _fold_bn(gamma, beta, mean, var, bias=None):
    s = gamma / jnp.sqrt(var + BN_EPS)
    b = bias if bias is not None else jnp.zeros_like(mean)
    t = (b - mean) * s + beta
    return s, t


def _init_bn(key, c):
    k1, k2, k3, k4 = jax.random.split(key, 4)
    gamma = 1.0 + 0.1 * jax.random.normal(k1, (c,), jnp.float32)
    beta = 0.1 * jax.random.normal(k2, (c,), jnp.float32)
    mean = 0.1 * jax.random.normal(k3, (c,), jnp.float32)
    var = jax.random.uniform(k4, (c,), jnp.float32, minval=0.5, maxval=1.5)
    return gamma, beta, mean, var


def _init_raw_block(key, d_in, d_out, d_med):
    ks = jax.random.split(key, 10)
    if d_in != d_out:
        ds_w_t = jax.random.normal(ks[0], (d_out, d_in), jnp.float32) / jnp.sqrt(d_in)
        ds_b = 0.1 * jax.random.normal(ks[1], (d_out,), jnp.float32)
    else:
        ds_w_t, ds_b = None, None            # nn.Sequential() identity downsample
    w1_t = jax.random.normal(ks[2], (d_med, d_in), jnp.float32) / jnp.sqrt(d_in)
    b1 = 0.1 * jax.random.normal(ks[3], (d_med,), jnp.float32)
    bn1 = _init_bn(ks[4], d_med)
    w2_t = jax.random.normal(ks[5], (d_med, d_med, 3), jnp.float32) / jnp.sqrt(3 * d_med)
    bn2 = _init_bn(ks[6], d_med)
    w3_t = jax.random.normal(ks[7], (d_out, d_med), jnp.float32) / jnp.sqrt(d_med)
    b3 = 0.1 * jax.random.normal(ks[8], (d_out,), jnp.float32)
    bn3 = _init_bn(ks[9], d_out)
    return dict(ds_w_t=ds_w_t, ds_b=ds_b, w1_t=w1_t, b1=b1, bn1=bn1,
                w2_t=w2_t, bn2=bn2, w3_t=w3_t, b3=b3, bn3=bn3)


def init_raw_params(key, seq_len, feat_len, dim_out, resnet_blocks):
    d_med = dim_out // 4
    keys = jax.random.split(key, resnet_blocks + 2)
    blocks = []
    d_in = feat_len
    for i in range(resnet_blocks):
        blocks.append(_init_raw_block(keys[i], d_in, dim_out, d_med))
        d_in = dim_out
    fc_in = dim_out * seq_len
    fc_w_t = jax.random.normal(keys[-2], (dim_out, fc_in), jnp.float32) / jnp.sqrt(fc_in)
    fc_b = 0.1 * jax.random.normal(keys[-1], (dim_out,), jnp.float32)
    return dict(blocks=blocks, fc_w_t=fc_w_t, fc_b=fc_b)


def pack_params(raw, seq_len, dot_dtype=jnp.bfloat16):
    """Fold BN/bias into weights and lay everything out for the fused kernels."""
    metas, flat = [], []
    for p in raw["blocks"]:
        c_med, _c_in = p["w1_t"].shape
        c_out = p["w3_t"].shape[0]
        s1, t1 = _fold_bn(*p["bn1"], bias=p["b1"])
        s2, t2 = _fold_bn(*p["bn2"])
        s3, t3 = _fold_bn(*p["bn3"], bias=p["b3"])
        w1s = (p["w1_t"].T * s1).astype(dot_dtype)                        # (C_in, C_med)
        w2s = (jnp.transpose(p["w2_t"], (2, 1, 0)) * s2).astype(dot_dtype)  # (3, C_med, C_med)
        w3s = (p["w3_t"].T * s3).astype(dot_dtype)                        # (C_med, C_out)
        has_ds = p["ds_w_t"] is not None

        # Pack per-channel shifts into a single (4, C_pad) f32 tile:
        # row 0 = downsample bias (or 0), 1 = t1, 2 = t2, 3 = t3.
        c_pad = max(c_out, c_med)

        def pad(v, _c=c_pad):
            return jnp.pad(v, (0, _c - v.shape[0]))

        ds_b = p["ds_b"] if has_ds else jnp.zeros((c_out,), jnp.float32)
        shifts = jnp.stack([pad(ds_b), pad(t1), pad(t2), pad(t3)]).astype(jnp.float32)

        if has_ds:
            flat.append(p["ds_w_t"].T.astype(dot_dtype))                  # (C_in, C_out)
        flat += [w1s, w2s, w3s, shifts]
        metas.append((bool(has_ds), int(c_out), int(c_med)))

    # fc: torch Linear weight is (O, C_out*L) over an NCL flatten (channel-major);
    # permute to our (l, c)-major flatten so y2d @ fc_w matches torch exactly.
    o_dim, _k_dim = raw["fc_w_t"].shape
    c_out = metas[-1][1]
    fc_w = (raw["fc_w_t"].reshape(o_dim, c_out, seq_len)
            .transpose(2, 1, 0).reshape(seq_len * c_out, o_dim).astype(dot_dtype))
    fc_b = raw["fc_b"].reshape(1, -1).astype(jnp.float32)
    return tuple(flat), tuple(metas), fc_w, fc_b


# ---------------------------------------------------------------------------
# Pure-JAX reference (independent math, same bf16-matmul / f32-accum policy)
# ---------------------------------------------------------------------------
def reference_forward(x, raw, clip_value, dot_dtype=jnp.bfloat16):
    b0, b1, seq_len, feat_len = x.shape
    h = (x.reshape(b0 * b1, seq_len, feat_len)
         .astype(dot_dtype).astype(jnp.float32))     # same input quantization as kernel

    def mm(a, w):
        return jnp.einsum("nlc,cd->nld", a.astype(dot_dtype), w.astype(dot_dtype),
                          preferred_element_type=jnp.float32)

    for p in raw["blocks"]:
        s1, t1 = _fold_bn(*p["bn1"], bias=p["b1"])
        s2, t2 = _fold_bn(*p["bn2"])
        s3, t3 = _fold_bn(*p["bn3"], bias=p["b3"])
        if p["ds_w_t"] is not None:
            x1 = mm(h, p["ds_w_t"].T) + p["ds_b"]
        else:
            x1 = h
        x1 = jnp.clip(x1, -clip_value, clip_value)
        a = _leaky(mm(h, p["w1_t"].T * s1) + t1)
        a_m1 = jnp.pad(a[:, :-1], ((0, 0), (1, 0), (0, 0)))
        a_p1 = jnp.pad(a[:, 1:], ((0, 0), (0, 1), (0, 0)))
        w2 = jnp.transpose(p["w2_t"], (2, 1, 0)) * s2
        g = _leaky(mm(a_m1, w2[0]) + mm(a, w2[1]) + mm(a_p1, w2[2]) + t2)
        z = _leaky(mm(g, p["w3_t"].T * s3) + t3)
        h = x1 + z
    # torch: fc_out(output.flatten(start_dim=1)) with output in NCL layout.
    h_flat = jnp.transpose(h, (0, 2, 1)).reshape(h.shape[0], -1)
    out = jnp.einsum("nk,ok->no", h_flat.astype(dot_dtype),
                     raw["fc_w_t"].astype(dot_dtype),
                     preferred_element_type=jnp.float32) + raw["fc_b"]
    return out.reshape(b0, b1, -1)


if __name__ == "__main__":
    seq_len, feat_len, dim_out, n_blocks = 8, 16, 32, 3
    B0, B1 = 2, 2
    clip_value = 10.0
    dot_dtype = jnp.bfloat16

    key = jax.random.PRNGKey(0)
    kx, kp = jax.random.split(key)
    x = jax.random.normal(kx, (B0, B1, seq_len, feat_len), jnp.float32)
    raw = init_raw_params(kp, seq_len, feat_len, dim_out, n_blocks)
    block_weights, metas, fc_w, fc_b = pack_params(raw, seq_len, dot_dtype)

    out = mod_resnet_1d_forward(x, block_weights, fc_w, fc_b, metas=metas,
                                clip_value=clip_value, dot_dtype=dot_dtype)
    out = jax.block_until_ready(out)
    assert out.shape == (B0, B1, dim_out), out.shape

    ref = reference_forward(x, raw, clip_value, dot_dtype)
    err = float(jnp.max(jnp.abs(out - ref)))
    scale = float(jnp.max(jnp.abs(ref)))
    assert err <= 1e-2 * max(1.0, scale), f"mismatch vs reference: {err} (scale={scale})"

    print("KERNEL_OK")
</pallas_src>

<mosaic_0001>
module attributes {stable_mosaic.version = 11 : i64} {
  func.func @kernel(%arg0: i32, %arg1: memref<16x16xbf16, #tpu.memory_space<vmem>>, %arg2: memref<16x32xbf16, #tpu.memory_space<vmem>>, %arg3: memref<16x8xbf16, #tpu.memory_space<vmem>>, %arg4: memref<3x8x8xbf16, #tpu.memory_space<vmem>>, %arg5: memref<8x32xbf16, #tpu.memory_space<vmem>>, %arg6: memref<4x32xf32, #tpu.memory_space<vmem>>, %arg7: memref<32x8xbf16, #tpu.memory_space<vmem>>, %arg8: memref<3x8x8xbf16, #tpu.memory_space<vmem>>, %arg9: memref<8x32xbf16, #tpu.memory_space<vmem>>, %arg10: memref<4x32xf32, #tpu.memory_space<vmem>>, %arg11: memref<32x8xbf16, #tpu.memory_space<vmem>>, %arg12: memref<3x8x8xbf16, #tpu.memory_space<vmem>>, %arg13: memref<8x32xbf16, #tpu.memory_space<vmem>>, %arg14: memref<4x32xf32, #tpu.memory_space<vmem>>, %arg15: memref<16x32xbf16, #tpu.memory_space<vmem>>) attributes {dimension_semantics = [#tpu.dimension_semantics<parallel>], iteration_bounds = array<i64: 2>, scalar_prefetch = 0 : i64, scratch_operands = 0 : i64, tpu.core_type = #tpu.core_type<tc>, window_params = [{transform_indices = @transform_0, window_bounds = array<i64: 16, 16>}, {pipeline_mode = #tpu.pipeline_mode<synchronous>, transform_indices = @transform_1, window_bounds = array<i64: 16, 32>}, {pipeline_mode = #tpu.pipeline_mode<synchronous>, transform_indices = @transform_2, window_bounds = array<i64: 16, 8>}, {pipeline_mode = #tpu.pipeline_mode<synchronous>, transform_indices = @transform_3, window_bounds = array<i64: 3, 8, 8>}, {pipeline_mode = #tpu.pipeline_mode<synchronous>, transform_indices = @transform_4, window_bounds = array<i64: 8, 32>}, {pipeline_mode = #tpu.pipeline_mode<synchronous>, transform_indices = @transform_5, window_bounds = array<i64: 4, 32>}, {pipeline_mode = #tpu.pipeline_mode<synchronous>, transform_indices = @transform_6, window_bounds = array<i64: 32, 8>}, {pipeline_mode = #tpu.pipeline_mode<synchronous>, transform_indices = @transform_7, window_bounds = array<i64: 3, 8, 8>}, {pipeline_mode = #tpu.pipeline_mode<synchronous>, transform_indices = @transform_8, window_bounds = array<i64: 8, 32>}, {pipeline_mode = #tpu.pipeline_mode<synchronous>, transform_indices = @transform_9, window_bounds = array<i64: 4, 32>}, {pipeline_mode = #tpu.pipeline_mode<synchronous>, transform_indices = @transform_10, window_bounds = array<i64: 32, 8>}, {pipeline_mode = #tpu.pipeline_mode<synchronous>, transform_indices = @transform_11, window_bounds = array<i64: 3, 8, 8>}, {pipeline_mode = #tpu.pipeline_mode<synchronous>, transform_indices = @transform_12, window_bounds = array<i64: 8, 32>}, {pipeline_mode = #tpu.pipeline_mode<synchronous>, transform_indices = @transform_13, window_bounds = array<i64: 4, 32>}, {transform_indices = @transform_14, window_bounds = array<i64: 16, 32>}]} {
    %c0 = arith.constant 0 : index
    %c0_0 = arith.constant 0 : index
    %0 = vector.load %arg1[%c0, %c0_0] : memref<16x16xbf16, #tpu.memory_space<vmem>>, vector<16x16xbf16>
    %1 = arith.extf %0 : vector<16x16xbf16> to vector<16x16xf32>
    %2 = tpu.iota {dimensions = array<i32: 0>} : vector<16x1xi32>
    %c8_i32 = arith.constant 8 : i32
    %c0_i32 = arith.constant 0 : i32
    %3 = arith.cmpi eq, %c8_i32, %c0_i32 : i32
    %c1_i32 = arith.constant 1 : i32
    %4 = arith.select %3, %c1_i32, %c8_i32 : i32
    %5 = vector.broadcast %4 : i32 to vector<16x1xi32>
    %6 = arith.remsi %2, %5 : vector<16x1xi32>
    %c0_i32_1 = arith.constant 0 : i32
    %7 = vector.broadcast %c0_i32_1 : i32 to vector<16x1xi32>
    %8 = arith.cmpi ne, %6, %7 : vector<16x1xi32>
    %c0_i32_2 = arith.constant 0 : i32
    %9 = vector.broadcast %c0_i32_2 : i32 to vector<16x1xi32>
    %10 = arith.cmpi slt, %6, %9 : vector<16x1xi32>
    %c0_i32_3 = arith.constant 0 : i32
    %11 = arith.cmpi slt, %4, %c0_i32_3 : i32
    %12 = vector.broadcast %11 : i1 to vector<16x1xi1>
    %13 = vector.broadcast %12 : vector<16x1xi1> to vector<16x1xi1>
    %14 = arith.xori %10, %13 : vector<16x1xi1>
    %15 = arith.andi %14, %8 : vector<16x1xi1>
    %16 = vector.broadcast %4 : i32 to vector<16x1xi32>
    %17 = arith.addi %6, %16 : vector<16x1xi32>
    %18 = arith.select %15, %17, %6 : vector<16x1xi1>, vector<16x1xi32>
    %c0_i32_4 = arith.constant 0 : i32
    %19 = vector.broadcast %c0_i32_4 : i32 to vector<16x1xi32>
    %20 = arith.cmpi ne, %18, %19 : vector<16x1xi32>
    %c7_i32 = arith.constant 7 : i32
    %21 = vector.broadcast %c7_i32 : i32 to vector<16x1xi32>
    %22 = arith.cmpi ne, %18, %21 : vector<16x1xi32>
    %23 = arith.truncf %1 : vector<16x16xf32> to vector<16x16xbf16>
    %c0_5 = arith.constant 0 : index
    %c0_6 = arith.constant 0 : index
    %24 = vector.load %arg6[%c0_5, %c0_6] : memref<4x32xf32, #tpu.memory_space<vmem>>, vector<1x32xf32>
    %c0_7 = arith.constant 0 : index
    %c0_8 = arith.constant 0 : index
    %25 = vector.load %arg2[%c0_7, %c0_8] : memref<16x32xbf16, #tpu.memory_space<vmem>>, vector<16x32xbf16>
    %cst = arith.constant dense<0.000000e+00> : vector<16x32xf32>
    %26 = tpu.matmul %23, %25, %cst {dimension_numbers = #tpu.dot_dimension_numbers<[1], [0], [0], [1], [0, 0, 1, 1], [], []>} : vector<16x16xbf16>, vector<16x32xbf16>, vector<16x32xf32> -> vector<16x32xf32>
    %27 = vector.broadcast %24 : vector<1x32xf32> to vector<16x32xf32>
    %28 = arith.addf %26, %27 : vector<16x32xf32>
    %cst_9 = arith.constant -1.000000e+01 : f32
    %cst_10 = arith.constant 1.000000e+01 : f32
    %29 = vector.broadcast %cst_9 : f32 to vector<16x32xf32>
    %30 = arith.maximumf %29, %28 : vector<16x32xf32>
    %31 = vector.broadcast %cst_10 : f32 to vector<16x32xf32>
    %32 = arith.minimumf %31, %30 : vector<16x32xf32>
    %c1 = arith.constant 1 : index
    %c0_11 = arith.constant 0 : index
    %33 = vector.load %arg6[%c1, %c0_11] : memref<4x32xf32, #tpu.memory_space<vmem>>, vector<1x8xf32>
    %c2 = arith.constant 2 : index
    %c0_12 = arith.constant 0 : index
    %34 = vector.load %arg6[%c2, %c0_12] : memref<4x32xf32, #tpu.memory_space<vmem>>, vector<1x8xf32>
    %c3 = arith.constant 3 : index
    %c0_13 = arith.constant 0 : index
    %35 = vector.load %arg6[%c3, %c0_13] : memref<4x32xf32, #tpu.memory_space<vmem>>, vector<1x32xf32>
    %c0_14 = arith.constant 0 : index
    %c0_15 = arith.constant 0 : index
    %36 = vector.load %arg3[%c0_14, %c0_15] : memref<16x8xbf16, #tpu.memory_space<vmem>>, vector<16x8xbf16>
    %cst_16 = arith.constant dense<0.000000e+00> : vector<16x8xf32>
    %37 = tpu.matmul %23, %36, %cst_16 {dimension_numbers = #tpu.dot_dimension_numbers<[1], [0], [0], [1], [0, 0, 1, 1], [], []>} : vector<16x16xbf16>, vector<16x8xbf16>, vector<16x8xf32> -> vector<16x8xf32>
    %38 = vector.broadcast %33 : vector<1x8xf32> to vector<16x8xf32>
    %39 = arith.addf %37, %38 : vector<16x8xf32>
    %cst_17 = arith.constant 0.000000e+00 : f32
    %40 = vector.broadcast %cst_17 : f32 to vector<16x8xf32>
    %41 = arith.cmpf ogt, %39, %40 : vector<16x8xf32>
    %cst_18 = arith.constant 0.00999999977 : f32
    %42 = vector.broadcast %cst_18 : f32 to vector<16x8xf32>
    %43 = arith.mulf %42, %39 : vector<16x8xf32>
    %44 = arith.select %41, %39, %43 : vector<16x8xi1>, vector<16x8xf32>
    %c1_i32_19 = arith.constant 1 : i32
    %45 = tpu.dynamic_rotate %44 by %c1_i32_19 dim 0 : vector<16x8xf32>, i32 -> vector<16x8xf32>
    %cst_20 = arith.constant 0.000000e+00 : f32
    %46 = vector.shape_cast %20 : vector<16x1xi1> to vector<16x1xi1>
    %47 = vector.broadcast %46 : vector<16x1xi1> to vector<16x8xi1>
    %48 = vector.broadcast %cst_20 : f32 to vector<16x8xf32>
    %49 = arith.select %47, %45, %48 : vector<16x8xi1>, vector<16x8xf32>
    %c15_i32 = arith.constant 15 : i32
    %50 = tpu.dynamic_rotate %44 by %c15_i32 dim 0 : vector<16x8xf32>, i32 -> vector<16x8xf32>
    %cst_21 = arith.constant 0.000000e+00 : f32
    %51 = vector.shape_cast %22 : vector<16x1xi1> to vector<16x1xi1>
    %52 = vector.broadcast %51 : vector<16x1xi1> to vector<16x8xi1>
    %53 = vector.broadcast %cst_21 : f32 to vector<16x8xf32>
    %54 = arith.select %52, %50, %53 : vector<16x8xi1>, vector<16x8xf32>
    %55 = arith.truncf %49 : vector<16x8xf32> to vector<16x8xbf16>
    %c0_22 = arith.constant 0 : index
    %c0_23 = arith.constant 0 : index
    %c0_24 = arith.constant 0 : index
    %56 = vector.load %arg4[%c0_22, %c0_23, %c0_24] : memref<3x8x8xbf16, #tpu.memory_space<vmem>>, vector<1x8x8xbf16>
    %57 = vector.shape_cast %56 : vector<1x8x8xbf16> to vector<8x8xbf16>
    %cst_25 = arith.constant dense<0.000000e+00> : vector<16x8xf32>
    %58 = tpu.matmul %55, %57, %cst_25 {dimension_numbers = #tpu.dot_dimension_numbers<[1], [0], [0], [1], [0, 0, 1, 1], [], []>} : vector<16x8xbf16>, vector<8x8xbf16>, vector<16x8xf32> -> vector<16x8xf32>
    %59 = arith.truncf %44 : vector<16x8xf32> to vector<16x8xbf16>
    %c1_26 = arith.constant 1 : index
    %c0_27 = arith.constant 0 : index
    %c0_28 = arith.constant 0 : index
    %60 = vector.load %arg4[%c1_26, %c0_27, %c0_28] : memref<3x8x8xbf16, #tpu.memory_space<vmem>>, vector<1x8x8xbf16>
    %61 = vector.shape_cast %60 : vector<1x8x8xbf16> to vector<8x8xbf16>
    %cst_29 = arith.constant dense<0.000000e+00> : vector<16x8xf32>
    %62 = tpu.matmul %59, %61, %cst_29 {dimension_numbers = #tpu.dot_dimension_numbers<[1], [0], [0], [1], [0, 0, 1, 1], [], []>} : vector<16x8xbf16>, vector<8x8xbf16>, vector<16x8xf32> -> vector<16x8xf32>
    %63 = arith.addf %58, %62 : vector<16x8xf32>
    %64 = arith.truncf %54 : vector<16x8xf32> to vector<16x8xbf16>
    %c2_30 = arith.constant 2 : index
    %c0_31 = arith.constant 0 : index
    %c0_32 = arith.constant 0 : index
    %65 = vector.load %arg4[%c2_30, %c0_31, %c0_32] : memref<3x8x8xbf16, #tpu.memory_space<vmem>>, vector<1x8x8xbf16>
    %66 = vector.shape_cast %65 : vector<1x8x8xbf16> to vector<8x8xbf16>
    %cst_33 = arith.constant dense<0.000000e+00> : vector<16x8xf32>
    %67 = tpu.matmul %64, %66, %cst_33 {dimension_numbers = #tpu.dot_dimension_numbers<[1], [0], [0], [1], [0, 0, 1, 1], [], []>} : vector<16x8xbf16>, vector<8x8xbf16>, vector<16x8xf32> -> vector<16x8xf32>
    %68 = arith.addf %63, %67 : vector<16x8xf32>
    %69 = vector.broadcast %34 : vector<1x8xf32> to vector<16x8xf32>
    %70 = arith.addf %68, %69 : vector<16x8xf32>
    %cst_34 = arith.constant 0.000000e+00 : f32
    %71 = vector.broadcast %cst_34 : f32 to vector<16x8xf32>
    %72 = arith.cmpf ogt, %70, %71 : vector<16x8xf32>
    %cst_35 = arith.constant 0.00999999977 : f32
    %73 = vector.broadcast %cst_35 : f32 to vector<16x8xf32>
    %74 = arith.mulf %73, %70 : vector<16x8xf32>
    %75 = arith.select %72, %70, %74 : vector<16x8xi1>, vector<16x8xf32>
    %76 = arith.truncf %75 : vector<16x8xf32> to vector<16x8xbf16>
    %c0_36 = arith.constant 0 : index
    %c0_37 = arith.constant 0 : index
    %77 = vector.load %arg5[%c0_36, %c0_37] : memref<8x32xbf16, #tpu.memory_space<vmem>>, vector<8x32xbf16>
    %cst_38 = arith.constant dense<0.000000e+00> : vector<16x32xf32>
    %78 = tpu.matmul %76, %77, %cst_38 {dimension_numbers = #tpu.dot_dimension_numbers<[1], [0], [0], [1], [0, 0, 1, 1], [], []>} : vector<16x8xbf16>, vector<8x32xbf16>, vector<16x32xf32> -> vector<16x32xf32>
    %79 = vector.broadcast %35 : vector<1x32xf32> to vector<16x32xf32>
    %80 = arith.addf %78, %79 : vector<16x32xf32>
    %cst_39 = arith.constant 0.000000e+00 : f32
    %81 = vector.broadcast %cst_39 : f32 to vector<16x32xf32>
    %82 = arith.cmpf ogt, %80, %81 : vector<16x32xf32>
    %cst_40 = arith.constant 0.00999999977 : f32
    %83 = vector.broadcast %cst_40 : f32 to vector<16x32xf32>
    %84 = arith.mulf %83, %80 : vector<16x32xf32>
    %85 = arith.select %82, %80, %84 : vector<16x32xi1>, vector<16x32xf32>
    %86 = arith.addf %32, %85 : vector<16x32xf32>
    %87 = arith.truncf %86 : vector<16x32xf32> to vector<16x32xbf16>
    %cst_41 = arith.constant -1.000000e+01 : f32
    %cst_42 = arith.constant 1.000000e+01 : f32
    %88 = vector.broadcast %cst_41 : f32 to vector<16x32xf32>
    %89 = arith.maximumf %88, %86 : vector<16x32xf32>
    %90 = vector.broadcast %cst_42 : f32 to vector<16x32xf32>
    %91 = arith.minimumf %90, %89 : vector<16x32xf32>
    %c1_43 = arith.constant 1 : index
    %c0_44 = arith.constant 0 : index
    %92 = vector.load %arg10[%c1_43, %c0_44] : memref<4x32xf32, #tpu.memory_space<vmem>>, vector<1x8xf32>
    %c2_45 = arith.constant 2 : index
    %c0_46 = arith.constant 0 : index
    %93 = vector.load %arg10[%c2_45, %c0_46] : memref<4x32xf32, #tpu.memory_space<vmem>>, vector<1x8xf32>
    %c3_47 = arith.constant 3 : index
    %c0_48 = arith.constant 0 : index
    %94 = vector.load %arg10[%c3_47, %c0_48] : memref<4x32xf32, #tpu.memory_space<vmem>>, vector<1x32xf32>
    %c0_49 = arith.constant 0 : index
    %c0_50 = arith.constant 0 : index
    %95 = vector.load %arg7[%c0_49, %c0_50] : memref<32x8xbf16, #tpu.memory_space<vmem>>, vector<32x8xbf16>
    %cst_51 = arith.constant dense<0.000000e+00> : vector<16x8xf32>
    %96 = tpu.matmul %87, %95, %cst_51 {dimension_numbers = #tpu.dot_dimension_numbers<[1], [0], [0], [1], [0, 0, 1, 1], [], []>} : vector<16x32xbf16>, vector<32x8xbf16>, vector<16x8xf32> -> vector<16x8xf32>
    %97 = vector.broadcast %92 : vector<1x8xf32> to vector<16x8xf32>
    %98 = arith.addf %96, %97 : vector<16x8xf32>
    %cst_52 = arith.constant 0.000000e+00 : f32
    %99 = vector.broadcast %cst_52 : f32 to vector<16x8xf32>
    %100 = arith.cmpf ogt, %98, %99 : vector<16x8xf32>
    %cst_53 = arith.constant 0.00999999977 : f32
    %101 = vector.broadcast %cst_53 : f32 to vector<16x8xf32>
    %102 = arith.mulf %101, %98 : vector<16x8xf32>
    %103 = arith.select %100, %98, %102 : vector<16x8xi1>, vector<16x8xf32>
    %c1_i32_54 = arith.constant 1 : i32
    %104 = tpu.dynamic_rotate %103 by %c1_i32_54 dim 0 : vector<16x8xf32>, i32 -> vector<16x8xf32>
    %cst_55 = arith.constant 0.000000e+00 : f32
    %105 = vector.shape_cast %20 : vector<16x1xi1> to vector<16x1xi1>
    %106 = vector.broadcast %105 : vector<16x1xi1> to vector<16x8xi1>
    %107 = vector.broadcast %cst_55 : f32 to vector<16x8xf32>
    %108 = arith.select %106, %104, %107 : vector<16x8xi1>, vector<16x8xf32>
    %c15_i32_56 = arith.constant 15 : i32
    %109 = tpu.dynamic_rotate %103 by %c15_i32_56 dim 0 : vector<16x8xf32>, i32 -> vector<16x8xf32>
    %cst_57 = arith.constant 0.000000e+00 : f32
    %110 = vector.shape_cast %22 : vector<16x1xi1> to vector<16x1xi1>
    %111 = vector.broadcast %110 : vector<16x1xi1> to vector<16x8xi1>
    %112 = vector.broadcast %cst_57 : f32 to vector<16x8xf32>
    %113 = arith.select %111, %109, %112 : vector<16x8xi1>, vector<16x8xf32>
    %114 = arith.truncf %108 : vector<16x8xf32> to vector<16x8xbf16>
    %c0_58 = arith.constant 0 : index
    %c0_59 = arith.constant 0 : index
    %c0_60 = arith.constant 0 : index
    %115 = vector.load %arg8[%c0_58, %c0_59, %c0_60] : memref<3x8x8xbf16, #tpu.memory_space<vmem>>, vector<1x8x8xbf16>
    %116 = vector.shape_cast %115 : vector<1x8x8xbf16> to vector<8x8xbf16>
    %cst_61 = arith.constant dense<0.000000e+00> : vector<16x8xf32>
    %117 = tpu.matmul %114, %116, %cst_61 {dimension_numbers = #tpu.dot_dimension_numbers<[1], [0], [0], [1], [0, 0, 1, 1], [], []>} : vector<16x8xbf16>, vector<8x8xbf16>, vector<16x8xf32> -> vector<16x8xf32>
    %118 = arith.truncf %103 : vector<16x8xf32> to vector<16x8xbf16>
    %c1_62 = arith.constant 1 : index
    %c0_63 = arith.constant 0 : index
    %c0_64 = arith.constant 0 : index
    %119 = vector.load %arg8[%c1_62, %c0_63, %c0_64] : memref<3x8x8xbf16, #tpu.memory_space<vmem>>, vector<1x8x8xbf16>
    %120 = vector.shape_cast %119 : vector<1x8x8xbf16> to vector<8x8xbf16>
    %cst_65 = arith.constant dense<0.000000e+00> : vector<16x8xf32>
    %121 = tpu.matmul %118, %120, %cst_65 {dimension_numbers = #tpu.dot_dimension_numbers<[1], [0], [0], [1], [0, 0, 1, 1], [], []>} : vector<16x8xbf16>, vector<8x8xbf16>, vector<16x8xf32> -> vector<16x8xf32>
    %122 = arith.addf %117, %121 : vector<16x8xf32>
    %123 = arith.truncf %113 : vector<16x8xf32> to vector<16x8xbf16>
    %c2_66 = arith.constant 2 : index
    %c0_67 = arith.constant 0 : index
    %c0_68 = arith.constant 0 : index
    %124 = vector.load %arg8[%c2_66, %c0_67, %c0_68] : memref<3x8x8xbf16, #tpu.memory_space<vmem>>, vector<1x8x8xbf16>
    %125 = vector.shape_cast %124 : vector<1x8x8xbf16> to vector<8x8xbf16>
    %cst_69 = arith.constant dense<0.000000e+00> : vector<16x8xf32>
    %126 = tpu.matmul %123, %125, %cst_69 {dimension_numbers = #tpu.dot_dimension_numbers<[1], [0], [0], [1], [0, 0, 1, 1], [], []>} : vector<16x8xbf16>, vector<8x8xbf16>, vector<16x8xf32> -> vector<16x8xf32>
    %127 = arith.addf %122, %126 : vector<16x8xf32>
    %128 = vector.broadcast %93 : vector<1x8xf32> to vector<16x8xf32>
    %129 = arith.addf %127, %128 : vector<16x8xf32>
    %cst_70 = arith.constant 0.000000e+00 : f32
    %130 = vector.broadcast %cst_70 : f32 to vector<16x8xf32>
    %131 = arith.cmpf ogt, %129, %130 : vector<16x8xf32>
    %cst_71 = arith.constant 0.00999999977 : f32
    %132 = vector.broadcast %cst_71 : f32 to vector<16x8xf32>
    %133 = arith.mulf %132, %129 : vector<16x8xf32>
    %134 = arith.select %131, %129, %133 : vector<16x8xi1>, vector<16x8xf32>
    %135 = arith.truncf %134 : vector<16x8xf32> to vector<16x8xbf16>
    %c0_72 = arith.constant 0 : index
    %c0_73 = arith.constant 0 : index
    %136 = vector.load %arg9[%c0_72, %c0_73] : memref<8x32xbf16, #tpu.memory_space<vmem>>, vector<8x32xbf16>
    %cst_74 = arith.constant dense<0.000000e+00> : vector<16x32xf32>
    %137 = tpu.matmul %135, %136, %cst_74 {dimension_numbers = #tpu.dot_dimension_numbers<[1], [0], [0], [1], [0, 0, 1, 1], [], []>} : vector<16x8xbf16>, vector<8x32xbf16>, vector<16x32xf32> -> vector<16x32xf32>
    %138 = vector.broadcast %94 : vector<1x32xf32> to vector<16x32xf32>
    %139 = arith.addf %137, %138 : vector<16x32xf32>
    %cst_75 = arith.constant 0.000000e+00 : f32
    %140 = vector.broadcast %cst_75 : f32 to vector<16x32xf32>
    %141 = arith.cmpf ogt, %139, %140 : vector<16x32xf32>
    %cst_76 = arith.constant 0.00999999977 : f32
    %142 = vector.broadcast %cst_76 : f32 to vector<16x32xf32>
    %143 = arith.mulf %142, %139 : vector<16x32xf32>
    %144 = arith.select %141, %139, %143 : vector<16x32xi1>, vector<16x32xf32>
    %145 = arith.addf %91, %144 : vector<16x32xf32>
    %146 = arith.truncf %145 : vector<16x32xf32> to vector<16x32xbf16>
    %cst_77 = arith.constant -1.000000e+01 : f32
    %cst_78 = arith.constant 1.000000e+01 : f32
    %147 = vector.broadcast %cst_77 : f32 to vector<16x32xf32>
    %148 = arith.maximumf %147, %145 : vector<16x32xf32>
    %149 = vector.broadcast %cst_78 : f32 to vector<16x32xf32>
    %150 = arith.minimumf %149, %148 : vector<16x32xf32>
    %c1_79 = arith.constant 1 : index
    %c0_80 = arith.constant 0 : index
    %151 = vector.load %arg14[%c1_79, %c0_80] : memref<4x32xf32, #tpu.memory_space<vmem>>, vector<1x8xf32>
    %c2_81 = arith.constant 2 : index
    %c0_82 = arith.constant 0 : index
    %152 = vector.load %arg14[%c2_81, %c0_82] : memref<4x32xf32, #tpu.memory_space<vmem>>, vector<1x8xf32>
    %c3_83 = arith.constant 3 : index
    %c0_84 = arith.constant 0 : index
    %153 = vector.load %arg14[%c3_83, %c0_84] : memref<4x32xf32, #tpu.memory_space<vmem>>, vector<1x32xf32>
    %c0_85 = arith.constant 0 : index
    %c0_86 = arith.constant 0 : index
    %154 = vector.load %arg11[%c0_85, %c0_86] : memref<32x8xbf16, #tpu.memory_space<vmem>>, vector<32x8xbf16>
    %cst_87 = arith.constant dense<0.000000e+00> : vector<16x8xf32>
    %155 = tpu.matmul %146, %154, %cst_87 {dimension_numbers = #tpu.dot_dimension_numbers<[1], [0], [0], [1], [0, 0, 1, 1], [], []>} : vector<16x32xbf16>, vector<32x8xbf16>, vector<16x8xf32> -> vector<16x8xf32>
    %156 = vector.broadcast %151 : vector<1x8xf32> to vector<16x8xf32>
    %157 = arith.addf %155, %156 : vector<16x8xf32>
    %cst_88 = arith.constant 0.000000e+00 : f32
    %158 = vector.broadcast %cst_88 : f32 to vector<16x8xf32>
    %159 = arith.cmpf ogt, %157, %158 : vector<16x8xf32>
    %cst_89 = arith.constant 0.00999999977 : f32
    %160 = vector.broadcast %cst_89 : f32 to vector<16x8xf32>
    %161 = arith.mulf %160, %157 : vector<16x8xf32>
    %162 = arith.select %159, %157, %161 : vector<16x8xi1>, vector<16x8xf32>
    %c1_i32_90 = arith.constant 1 : i32
    %163 = tpu.dynamic_rotate %162 by %c1_i32_90 dim 0 : vector<16x8xf32>, i32 -> vector<16x8xf32>
    %cst_91 = arith.constant 0.000000e+00 : f32
    %164 = vector.shape_cast %20 : vector<16x1xi1> to vector<16x1xi1>
    %165 = vector.broadcast %164 : vector<16x1xi1> to vector<16x8xi1>
    %166 = vector.broadcast %cst_91 : f32 to vector<16x8xf32>
    %167 = arith.select %165, %163, %166 : vector<16x8xi1>, vector<16x8xf32>
    %c15_i32_92 = arith.constant 15 : i32
    %168 = tpu.dynamic_rotate %162 by %c15_i32_92 dim 0 : vector<16x8xf32>, i32 -> vector<16x8xf32>
    %cst_93 = arith.constant 0.000000e+00 : f32
    %169 = vector.shape_cast %22 : vector<16x1xi1> to vector<16x1xi1>
    %170 = vector.broadcast %169 : vector<16x1xi1> to vector<16x8xi1>
    %171 = vector.broadcast %cst_93 : f32 to vector<16x8xf32>
    %172 = arith.select %170, %168, %171 : vector<16x8xi1>, vector<16x8xf32>
    %173 = arith.truncf %167 : vector<16x8xf32> to vector<16x8xbf16>
    %c0_94 = arith.constant 0 : index
    %c0_95 = arith.constant 0 : index
    %c0_96 = arith.constant 0 : index
    %174 = vector.load %arg12[%c0_94, %c0_95, %c0_96] : memref<3x8x8xbf16, #tpu.memory_space<vmem>>, vector<1x8x8xbf16>
    %175 = vector.shape_cast %174 : vector<1x8x8xbf16> to vector<8x8xbf16>
    %cst_97 = arith.constant dense<0.000000e+00> : vector<16x8xf32>
    %176 = tpu.matmul %173, %175, %cst_97 {dimension_numbers = #tpu.dot_dimension_numbers<[1], [0], [0], [1], [0, 0, 1, 1], [], []>} : vector<16x8xbf16>, vector<8x8xbf16>, vector<16x8xf32> -> vector<16x8xf32>
    %177 = arith.truncf %162 : vector<16x8xf32> to vector<16x8xbf16>
    %c1_98 = arith.constant 1 : index
    %c0_99 = arith.constant 0 : index
    %c0_100 = arith.constant 0 : index
    %178 = vector.load %arg12[%c1_98, %c0_99, %c0_100] : memref<3x8x8xbf16, #tpu.memory_space<vmem>>, vector<1x8x8xbf16>
    %179 = vector.shape_cast %178 : vector<1x8x8xbf16> to vector<8x8xbf16>
    %cst_101 = arith.constant dense<0.000000e+00> : vector<16x8xf32>
    %180 = tpu.matmul %177, %179, %cst_101 {dimension_numbers = #tpu.dot_dimension_numbers<[1], [0], [0], [1], [0, 0, 1, 1], [], []>} : vector<16x8xbf16>, vector<8x8xbf16>, vector<16x8xf32> -> vector<16x8xf32>
    %181 = arith.addf %176, %180 : vector<16x8xf32>
    %182 = arith.truncf %172 : vector<16x8xf32> to vector<16x8xbf16>
    %c2_102 = arith.constant 2 : index
    %c0_103 = arith.constant 0 : index
    %c0_104 = arith.constant 0 : index
    %183 = vector.load %arg12[%c2_102, %c0_103, %c0_104] : memref<3x8x8xbf16, #tpu.memory_space<vmem>>, vector<1x8x8xbf16>
    %184 = vector.shape_cast %183 : vector<1x8x8xbf16> to vector<8x8xbf16>
    %cst_105 = arith.constant dense<0.000000e+00> : vector<16x8xf32>
    %185 = tpu.matmul %182, %184, %cst_105 {dimension_numbers = #tpu.dot_dimension_numbers<[1], [0], [0], [1], [0, 0, 1, 1], [], []>} : vector<16x8xbf16>, vector<8x8xbf16>, vector<16x8xf32> -> vector<16x8xf32>
    %186 = arith.addf %181, %185 : vector<16x8xf32>
    %187 = vector.broadcast %152 : vector<1x8xf32> to vector<16x8xf32>
    %188 = arith.addf %186, %187 : vector<16x8xf32>
    %cst_106 = arith.constant 0.000000e+00 : f32
    %189 = vector.broadcast %cst_106 : f32 to vector<16x8xf32>
    %190 = arith.cmpf ogt, %188, %189 : vector<16x8xf32>
    %cst_107 = arith.constant 0.00999999977 : f32
    %191 = vector.broadcast %cst_107 : f32 to vector<16x8xf32>
    %192 = arith.mulf %191, %188 : vector<16x8xf32>
    %193 = arith.select %190, %188, %192 : vector<16x8xi1>, vector<16x8xf32>
    %194 = arith.truncf %193 : vector<16x8xf32> to vector<16x8xbf16>
    %c0_108 = arith.constant 0 : index
    %c0_109 = arith.constant 0 : index
    %195 = vector.load %arg13[%c0_108, %c0_109] : memref<8x32xbf16, #tpu.memory_space<vmem>>, vector<8x32xbf16>
    %cst_110 = arith.constant dense<0.000000e+00> : vector<16x32xf32>
    %196 = tpu.matmul %194, %195, %cst_110 {dimension_numbers = #tpu.dot_dimension_numbers<[1], [0], [0], [1], [0, 0, 1, 1], [], []>} : vector<16x8xbf16>, vector<8x32xbf16>, vector<16x32xf32> -> vector<16x32xf32>
    %197 = vector.broadcast %153 : vector<1x32xf32> to vector<16x32xf32>
    %198 = arith.addf %196, %197 : vector<16x32xf32>
    %cst_111 = arith.constant 0.000000e+00 : f32
    %199 = vector.broadcast %cst_111 : f32 to vector<16x32xf32>
    %200 = arith.cmpf ogt, %198, %199 : vector<16x32xf32>
    %cst_112 = arith.constant 0.00999999977 : f32
    %201 = vector.broadcast %cst_112 : f32 to vector<16x32xf32>
    %202 = arith.mulf %201, %198 : vector<16x32xf32>
    %203 = arith.select %200, %198, %202 : vector<16x32xi1>, vector<16x32xf32>
    %204 = arith.addf %150, %203 : vector<16x32xf32>
    %205 = arith.truncf %204 : vector<16x32xf32> to vector<16x32xbf16>
    %c0_113 = arith.constant 0 : index
    %c0_114 = arith.constant 0 : index
    %206 = vector.load %arg15[%c0_113, %c0_114] : memref<16x32xbf16, #tpu.memory_space<vmem>>, vector<16x32xbf16>
    tpu.vector_store %arg15[%c0_113, %c0_114], %205 {strides = array<i32>} : memref<16x32xbf16, #tpu.memory_space<vmem>>, vector<16x32xbf16>,
    return
  }
  func.func @transform_0(%arg0: i32) -> (i32, i32) {
    %c0_i32 = arith.constant 0 : i32
    %c0_i32_0 = arith.constant 0 : i32
    return %arg0, %c0_i32 : i32, i32
  }
  func.func @transform_1(%arg0: i32) -> (i32, i32) {
    %c0_i32 = arith.constant 0 : i32
    %c0_i32_0 = arith.constant 0 : i32
    %c0_i32_1 = arith.constant 0 : i32
    return %c0_i32, %c0_i32_0 : i32, i32
  }
  func.func @transform_2(%arg0: i32) -> (i32, i32) {
    %c0_i32 = arith.constant 0 : i32
    %c0_i32_0 = arith.constant 0 : i32
    %c0_i32_1 = arith.constant 0 : i32
    return %c0_i32, %c0_i32_0 : i32, i32
  }
  func.func @transform_3(%arg0: i32) -> (i32, i32, i32) {
    %c0_i32 = arith.constant 0 : i32
    %c0_i32_0 = arith.constant 0 : i32
    %c0_i32_1 = arith.constant 0 : i32
    %c0_i32_2 = arith.constant 0 : i32
    return %c0_i32, %c0_i32_0, %c0_i32_1 : i32, i32, i32
  }
  func.func @transform_4(%arg0: i32) -> (i32, i32) {
    %c0_i32 = arith.constant 0 : i32
    %c0_i32_0 = arith.constant 0 : i32
    %c0_i32_1 = arith.constant 0 : i32
    return %c0_i32, %c0_i32_0 : i32, i32
  }
  func.func @transform_5(%arg0: i32) -> (i32, i32) {
    %c0_i32 = arith.constant 0 : i32
    %c0_i32_0 = arith.constant 0 : i32
    %c0_i32_1 = arith.constant 0 : i32
    return %c0_i32, %c0_i32_0 : i32, i32
  }
  func.func @transform_6(%arg0: i32) -> (i32, i32) {
    %c0_i32 = arith.constant 0 : i32
    %c0_i32_0 = arith.constant 0 : i32
    %c0_i32_1 = arith.constant 0 : i32
    return %c0_i32, %c0_i32_0 : i32, i32
  }
  func.func @transform_7(%arg0: i32) -> (i32, i32, i32) {
    %c0_i32 = arith.constant 0 : i32
    %c0_i32_0 = arith.constant 0 : i32
    %c0_i32_1 = arith.constant 0 : i32
    %c0_i32_2 = arith.constant 0 : i32
    return %c0_i32, %c0_i32_0, %c0_i32_1 : i32, i32, i32
  }
  func.func @transform_8(%arg0: i32) -> (i32, i32) {
    %c0_i32 = arith.constant 0 : i32
    %c0_i32_0 = arith.constant 0 : i32
    %c0_i32_1 = arith.constant 0 : i32
    return %c0_i32, %c0_i32_0 : i32, i32
  }
  func.func @transform_9(%arg0: i32) -> (i32, i32) {
    %c0_i32 = arith.constant 0 : i32
    %c0_i32_0 = arith.constant 0 : i32
    %c0_i32_1 = arith.constant 0 : i32
    return %c0_i32, %c0_i32_0 : i32, i32
  }
  func.func @transform_10(%arg0: i32) -> (i32, i32) {
    %c0_i32 = arith.constant 0 : i32
    %c0_i32_0 = arith.constant 0 : i32
    %c0_i32_1 = arith.constant 0 : i32
    return %c0_i32, %c0_i32_0 : i32, i32
  }
  func.func @transform_11(%arg0: i32) -> (i32, i32, i32) {
    %c0_i32 = arith.constant 0 : i32
    %c0_i32_0 = arith.constant 0 : i32
    %c0_i32_1 = arith.constant 0 : i32
    %c0_i32_2 = arith.constant 0 : i32
    return %c0_i32, %c0_i32_0, %c0_i32_1 : i32, i32, i32
  }
  func.func @transform_12(%arg0: i32) -> (i32, i32) {
    %c0_i32 = arith.constant 0 : i32
    %c0_i32_0 = arith.constant 0 : i32
    %c0_i32_1 = arith.constant 0 : i32
    return %c0_i32, %c0_i32_0 : i32, i32
  }
  func.func @transform_13(%arg0: i32) -> (i32, i32) {
    %c0_i32 = arith.constant 0 : i32
    %c0_i32_0 = arith.constant 0 : i32
    %c0_i32_1 = arith.constant 0 : i32
    return %c0_i32, %c0_i32_0 : i32, i32
  }
  func.func @transform_14(%arg0: i32) -> (i32, i32) {
    %c0_i32 = arith.constant 0 : i32
    %c0_i32_0 = arith.constant 0 : i32
    return %arg0, %c0_i32 : i32, i32
  }
}

module attributes {stable_mosaic.version = 11 : i64} {
  func.func @_fc_matmul_kernel(%arg0: i32, %arg1: i32, %arg2: i32, %arg3: memref<4x256xbf16, #tpu.memory_space<vmem>>, %arg4: memref<256x32xbf16, #tpu.memory_space<vmem>>, %arg5: memref<1x32xf32, #tpu.memory_space<vmem>>, %arg6: memref<4x32xf32, #tpu.memory_space<vmem>>, %arg7: memref<4x32xf32, #tpu.memory_space<vmem>>) attributes {dimension_semantics = [#tpu.dimension_semantics<parallel>, #tpu.dimension_semantics<parallel>, #tpu.dimension_semantics<arbitrary>], iteration_bounds = array<i64: 1, 1, 1>, scalar_prefetch = 0 : i64, scratch_operands = 1 : i64, tpu.core_type = #tpu.core_type<tc>, window_params = [{transform_indices = @transform_0, window_bounds = array<i64: 4, 256>}, {transform_indices = @transform_1, window_bounds = array<i64: 256, 32>}, {transform_indices = @transform_2, window_bounds = array<i64: 1, 32>}, {transform_indices = @transform_3, window_bounds = array<i64: 4, 32>}]} {
    %c0_i32 = arith.constant 0 : i32
    %0 = arith.cmpi eq, %arg2, %c0_i32 : i32
    %1 = arith.extui %0 : i1 to i32
    %c0_i32_0 = arith.constant 0 : i32
    %2 = arith.cmpi ne, %1, %c0_i32_0 : i32
    scf.if %2 {
      %cst_10 = arith.constant 0.000000e+00 : f32
      %12 = vector.broadcast %cst_10 : f32 to vector<4x32xf32>
      %c0_11 = arith.constant 0 : index
      %c0_12 = arith.constant 0 : index
      %13 = vector.load %arg7[%c0_11, %c0_12] : memref<4x32xf32, #tpu.memory_space<vmem>>, vector<4x32xf32>
      tpu.vector_store %arg7[%c0_11, %c0_12], %12 {strides = array<i32>} : memref<4x32xf32, #tpu.memory_space<vmem>>, vector<4x32xf32>,
    } else {
    }
    %c0 = arith.constant 0 : index
    %c0_1 = arith.constant 0 : index
    %3 = vector.load %arg7[%c0, %c0_1] : memref<4x32xf32, #tpu.memory_space<vmem>>, vector<4x32xf32>
    %c0_2 = arith.constant 0 : index
    %c0_3 = arith.constant 0 : index
    %4 = vector.load %arg3[%c0_2, %c0_3] : memref<4x256xbf16, #tpu.memory_space<vmem>>, vector<4x256xbf16>
    %c0_4 = arith.constant 0 : index
    %c0_5 = arith.constant 0 : index
    %5 = vector.load %arg4[%c0_4, %c0_5] : memref<256x32xbf16, #tpu.memory_space<vmem>>, vector<256x32xbf16>
    %cst = arith.constant dense<0.000000e+00> : vector<4x32xf32>
    %6 = tpu.matmul %4, %5, %cst {dimension_numbers = #tpu.dot_dimension_numbers<[1], [0], [0], [1], [0, 0, 1, 1], [], []>} : vector<4x256xbf16>, vector<256x32xbf16>, vector<4x32xf32> -> vector<4x32xf32>
    %7 = arith.addf %3, %6 : vector<4x32xf32>
    %c0_6 = arith.constant 0 : index
    %c0_7 = arith.constant 0 : index
    %8 = vector.load %arg7[%c0_6, %c0_7] : memref<4x32xf32, #tpu.memory_space<vmem>>, vector<4x32xf32>
    tpu.vector_store %arg7[%c0_6, %c0_7], %7 {strides = array<i32>} : memref<4x32xf32, #tpu.memory_space<vmem>>, vector<4x32xf32>,
    %c0_i32_8 = arith.constant 0 : i32
    %9 = arith.cmpi eq, %arg2, %c0_i32_8 : i32
    %10 = arith.extui %9 : i1 to i32
    %c0_i32_9 = arith.constant 0 : i32
    %11 = arith.cmpi ne, %10, %c0_i32_9 : i32
    scf.if %11 {
      %c0_10 = arith.constant 0 : index
      %c0_11 = arith.constant 0 : index
      %12 = vector.load %arg7[%c0_10, %c0_11] : memref<4x32xf32, #tpu.memory_space<vmem>>, vector<4x32xf32>
      %c0_12 = arith.constant 0 : index
      %c0_13 = arith.constant 0 : index
      %13 = vector.load %arg5[%c0_12, %c0_13] : memref<1x32xf32, #tpu.memory_space<vmem>>, vector<1x32xf32>
      %14 = vector.broadcast %13 : vector<1x32xf32> to vector<4x32xf32>
      %15 = arith.addf %12, %14 : vector<4x32xf32>
      %c0_14 = arith.constant 0 : index
      %c0_15 = arith.constant 0 : index
      %16 = vector.load %arg6[%c0_14, %c0_15] : memref<4x32xf32, #tpu.memory_space<vmem>>, vector<4x32xf32>
      tpu.vector_store %arg6[%c0_14, %c0_15], %15 {strides = array<i32>} : memref<4x32xf32, #tpu.memory_space<vmem>>, vector<4x32xf32>,
    } else {
    }
    return
  }
  func.func @transform_0(%arg0: i32, %arg1: i32, %arg2: i32) -> (i32, i32) {
    %c0_i32 = arith.constant 0 : i32
    return %arg0, %arg2 : i32, i32
  }
  func.func @transform_1(%arg0: i32, %arg1: i32, %arg2: i32) -> (i32, i32) {
    %c0_i32 = arith.constant 0 : i32
    return %arg2, %arg1 : i32, i32
  }
  func.func @transform_2(%arg0: i32, %arg1: i32, %arg2: i32) -> (i32, i32) {
    %c0_i32 = arith.constant 0 : i32
    %c0_i32_0 = arith.constant 0 : i32
    return %c0_i32, %arg1 : i32, i32
  }
  func.func @transform_3(%arg0: i32, %arg1: i32, %arg2: i32) -> (i32, i32) {
    %c0_i32 = arith.constant 0 : i32
    return %arg0, %arg1 : i32, i32
  }
}

</mosaic_0001>

<bundles_post_ra>
// kernel: mod_resnet_1d_forward.3
= control target key start
LH: loop header
LB: loop body
LE: loop exit
PB: predicated region body
PF: predicated region fallthrough
CT: control target
= control target key end

     0   :  { %s406_s0 = inlined_call_operand.vmem [shape: bf16[4,256], index: 0, kind: input, shape index: {}]   ;;  %s407_s1 = inlined_call_operand.vmem [shape: bf16[256,32], index: 1, kind: input, shape index: {}]   ;;  %s408_s2 = inlined_call_operand.vmem [shape: f32[1,32], index: 2, kind: input, shape index: {}]   ;;  %s409_s3 = inlined_call_operand.hbm [shape: f32[4,32], index: 3, kind: output, shape index: {}]  }
   0x1   :  { %v275_v0 = vld [vmem:[%s407_s1 + $0x40] sm:$0xff]   ;;  %v277_v2 = vld [vmem:[%s407_s1 + $0x48] sm:$0xff]   ;;  %v279_v4 = vld [vmem:[%s407_s1 + $0x50] sm:$0xff]  }
   0x2   :  { %v276_v1 = vld [vmem:[%s407_s1] sm:$0xff]   ;;  %251 = vmatprep.subr.bf16.mxu0 %v275_v0  ;;  %v278_v3 = vld [vmem:[%s407_s1 + $0x8] sm:$0xff]   ;;  %v280_v5 = vld [vmem:[%s407_s1 + $0x10] sm:$0xff]  }
   0x3   :  { %252 = vmatpush3.bf16.msra.mxu0 %v276_v1  ;;  %v281_v6 = vld [vmem:[%s407_s1 + $0x58] sm:$0xff]   ;;  %v283_v8 = vld [vmem:[%s407_s1 + $0x60] sm:$0xff]   ;;  %v285_v10 = vld [vmem:[%s407_s1 + $0x68] sm:$0xff]  }
   0x4   :  { %253 = vmatprep.subr.bf16.mxu0 %v277_v2  ;;  %v282_v7 = vld [vmem:[%s407_s1 + $0x18] sm:$0xff]   ;;  %v284_v9 = vld [vmem:[%s407_s1 + $0x20] sm:$0xff]  }
   0x5   :  { %v233_v11 = vld.sshfl [vmem:[%s406_s0] sm:$0x33 pattern:$0x76325410] }
   0x7   :  { %254 = vmatpush3.bf16.msra.mxu0 %v278_v3 }
   0x8   :  { %255 = vmatprep.subr.bf16.mxu0 %v279_v4 }
   0xb   :  { %256 = vmatpush3.bf16.msra.mxu0 %v280_v5 }
   0xc   :  { %257 = vmatprep.subr.bf16.mxu0 %v281_v6 }
   0xf   :  { %258 = vmatpush3.bf16.msra.mxu0 %v282_v7 }
  0x10   :  { %259 = vmatprep.subr.bf16.mxu0 %v283_v8 }
  0x11   :  { %8 = vsyncpa [#allocation4], 0  ;;  %v64_v12 = vcombine.high %v233_v11, %v233_v11  ;;  %v286_v13 = vld [vmem:[%s407_s1 + $0x28] sm:$0xff]   ;;  %v287_v14 = vld [vmem:[%s407_s1 + $0x70] sm:$0xff]   ;;  %vm20_vm0 = vcmask 257024   ;;  %v315_v18 = vmov 0.0  }
  0x12   :  { %v288_v15 = vld [vmem:[%s407_s1 + $0x30] sm:$0xff]   ;;  %v289_v16 = vld [vmem:[%s407_s1 + $0x78] sm:$0xff]   ;;  %21 = vst.msk [vmem:[#allocation2] sm:$0xf] %vm20_vm0, %v315_v18  ;;  %v250_v26 = vld [vmem:[%s408_s2] ss:$0 sm:$0xff] }
  0x13   :  { %260 = vmatpush3.bf16.msra.mxu0 %v284_v9  ;;  %195 = vmatprep.mubr.bf16.mxu0 %v64_v12  ;;  %v290_v17 = vld [vmem:[%s407_s1 + $0x38] sm:$0xff]   ;;  %s316_s1 = smov [#allocation3]  }
  0x14   :  { %261 = vmatprep.subr.bf16.mxu0 %v285_v10  ;;  %s225_s20 = sshll.u32 %s316_s1, 4  ;;  %s226_s20 = int_to_ptr.vmem [resolvable:$true] %s225_s20 }
  0x15   :  { %s291_s21 = scalar_lea.vmem %s226_s20, 64  ;;  %p296_p1 = scmp.lt.s32.totalorder %s226_s20, %s226_s20 }
  0x16   :  { %p292_p0 = scmp.ne.s32.totalorder %s226_s20, %s291_s21  ;;  %p297_p2 = scmp.lt.s32.totalorder %s291_s21, %s291_s21 }
  0x17   :  { %262 = vmatpush3.bf16.msra.mxu0 %v286_v13 }
  0x18   :  { %263 = vmatprep.subr.bf16.mxu0 %v287_v14  ;;  %p298_p3 = por %p297_p2, %p296_p1 }
  0x19   :  { %v22_v20 = vld [vmem:[#allocation2] sm:$0xf] }
  0x1a   :  { %p299_p4 = pnand %p298_p3, %p292_p0 }
  0x1b   :  { %264 = vmatpush3.bf16.msra.mxu0 %v288_v15 }
  0x1c   :  { %265 = vmatprep.subr.bf16.mxu0 %v289_v16 }
  0x1f   :  { %266 = vmatpush3.bf16.msra.mxu0 %v290_v17 }
  0x22   :  { %196 = vmatmul.mubr.bf16.vlgmr.msra.gmra.mrb[0].mxu0 %v233_v11 }
  0xf5   :  { %v267_v19 = vpop.f32.mrb[0].mxu0 }
  0xf6   :  { %v268_v21 = vpop.f32.mrb[1].mxu0 }
  0xf7   :  { %v269_v22 = vadd.f32 %v268_v21, %v267_v19  ;;  %v270_v23 = vpop.f32.mrb[2].mxu0 }
  0xf8   :  { %v271_v24 = vpop.f32.mrb[3].mxu0 }
  0xf9   :  { %v203_v25 = vadd.f32 %v269_v22, %v22_v20 }
  0xfb   :  { %205 = vst.msk [vmem:[#allocation2] sm:$0xf] %vm20_vm0, %v203_v25 }
 0x102   :  { %v209_v27 = vld [vmem:[#allocation2] sm:$0xf] }
 0x103   :  { %v217_v28 = vadd.f32 %v250_v26, %v209_v27 }
 0x105   :  { %218 = vst.msk [vmem:[#allocation3] sm:$0xf] %vm20_vm0, %v217_v28 }
 0x106   :  { %302 = shalt.err (!%p299_p4)
}
 0x107   :  { %s303_s24 = scalar_lea.hbm %s409_s3, 64 }
 0x108   :  { %p304_p5 = scmp.ne.s32.totalorder %s409_s3, %s303_s24  ;;  %p307_p6 = scmp.lt.u32.totalorder %s303_s24, %s409_s3 }
 0x10a   :  { %p309_p7 = pnand %p307_p6, %p304_p5 }
 0x10c   :  { %312 = shalt.err (!%p309_p7)
}
 0x10d   :  { %228 = dma.vmem_to_hbm [thread:$0]  %s226_s20, 64, %s409_s3, [#allocation4]  }
 0x10e   :  { %313 = dma.done.wait [#allocation4], 64  }
 0x10f   :  { %314 = vsyncadd [#allocation4], 4294967232 }
 0x110   :  { %232 = vsyncpa [#allocation4], 1 }

// kernel: mod_resnet_1d_forward.2
= control target key start
LH: loop header
LB: loop body
LE: loop exit
PB: predicated region body
PF: predicated region fallthrough
CT: control target
= control target key end

     0   :  { %s1874_s29 = smov 0   ;;  %s2150_s0 = inlined_call_operand.vmem [shape: bf16[32,16], index: 0, kind: input, shape index: {}]   ;;  %s2151_s1 = inlined_call_operand.vmem [shape: bf16[16,32], index: 1, kind: input, shape index: {}]   ;;  %s2152_s2 = inlined_call_operand.vmem [shape: bf16[16,8], index: 2, kind: input, shape index: {}]   ;;  %s2153_s3 = inlined_call_operand.vmem [shape: bf16[3,8,8], index: 3, kind: input, shape index: {}]   ;;  %s2154_s4 = inlined_call_operand.vmem [shape: bf16[8,32], index: 4, kind: input, shape index: {}]   ;;  %s2155_s5 = inlined_call_operand.vmem [shape: f32[4,32], index: 5, kind: input, shape index: {}]   ;;  %s2156_s6 = inlined_call_operand.vmem [shape: bf16[32,8], index: 6, kind: input, shape index: {}]   ;;  %s2157_s7 = inlined_call_operand.vmem [shape: bf16[3,8,8], index: 7, kind: input, shape index: {}]   ;;  %s2158_s8 = inlined_call_operand.vmem [shape: bf16[8,32], index: 8, kind: input, shape index: {}]   ;;  %s2159_s9 = inlined_call_operand.vmem [shape: f32[4,32], index: 9, kind: input, shape index: {}]   ;;  %s2160_s10 = inlined_call_operand.vmem [shape: bf16[32,8], index: 10, kind: input, shape index: {}]   ;;  %s2161_s11 = inlined_call_operand.vmem [shape: bf16[3,8,8], index: 11, kind: input, shape index: {}]   ;;  %s2162_s12 = inlined_call_operand.vmem [shape: bf16[8,32], index: 12, kind: input, shape index: {}]   ;;  %s2163_s13 = inlined_call_operand.vmem [shape: f32[4,32], index: 13, kind: input, shape index: {}]   ;;  %s2164_s14 = inlined_call_operand.vmem [shape: bf16[32,32], index: 14, kind: output, shape index: {}]  }
   0x1 LB: > { %s1578_s30 = sadd.s32 4294967295, %s1795_s29   ;;  %p1582_p0 = scmp.ge.s32.totalorder %s1795_s29, 1  ;;  %s1795_s29 = sphi %s1874_s29, %s24_s29  }
   0x2   : > { %p413_p1 = scmp.lt.s32.totalorder %s1795_s29, 3 }
   0x4   : > { %p414_p2 = pnand %p1582_p0, %p413_p1 }
   0x5   : > { %v1782_v0 = vld [vmem:[%s2152_s2] sm:$0xff] (!%p414_p2)   ;;  %v1797_v1 = vmov (!%p414_p2), 0.0   ;;  %s1583_s17 = sshll.u32 (!%p414_p2), %s1578_s30, 1  ;;  %vm1798_vm0 = vmmov (!%p414_p2), 0   ;;  %vm523_vm1 = vcmask (!%p414_p2), 130048   ;;  %vm665_vm2 = vcmask (!%p414_p2), 1043456  }
   0x6   : > { %417 = sbr.rel (%p414_p2) target bundleno = 2043 (0x7fb), region = 76  ;;  %1678 = vmatprep.subr.bf16.mxu1 (!%p414_p2), %v1797_v1  ;;  %1672 = vmatprep.subr.bf16.mxu0 (!%p414_p2), %v1797_v1  ;;  %v1784_v2 = vld [vmem:[%s2151_s1] sm:$0xff] (!%p414_p2)   ;;  %p460_p3 = scmp.lt.s32.totalorder (!%p414_p2), %s1583_s17, 3  ;;  %v474_v8 = vlaneseq (!%p414_p2)  ;;  %v1599_v26 = vld [vmem:[%s2153_s3 + $0x8] sm:$0xf] (!%p414_p2)  ;;  %vm661_vm10 = vcmask (!%p414_p2), 64512  }
   0x7   : > { %1679 = vmatpush3.bf16.msra.mxu1 (!%p414_p2), %v1782_v0  ;;  %1680 = vmatprep.mubr.msk.bf16.mxu1 (!%p414_p2), %vm1798_vm0, %v1797_v1  ;;  %v1596_v4 = vld [vmem:[%s2153_s3 + $0x4] sm:$0xf] (!%p414_p2)  ;;  %v657_v6 = vld [vmem:[%s2153_s3] sm:$0xf] (!%p414_p2)  ;;  %v764_v34 = vsel (!%p414_p2), %vm665_vm2, %v1599_v26, 0 }
   0x8   : > { %1673 = vmatpush3.bf16.msra.mxu0 (!%p414_p2), %v1784_v2  ;;  %1674 = vmatprep.mubr.msk.bf16.mxu0 (!%p414_p2), %vm1798_vm0, %v1797_v1  ;;  %v667_v5 = vsel (!%p414_p2), %vm665_vm2, %v1596_v4, 0  ;;  %v714_v7 = vsel (!%p414_p2), %vm665_vm2, %v657_v6, 0  ;;  %v1918_v9 = vshrl.u32 (!%p414_p2), %v474_v8, 7  ;;  %v1593_v10 = vld [vmem:[%s2155_s5 + $0x1] ss:$0 sm:$0xff] (!%p414_p2) }
   0x9   : > { %1684 = vmatprep.subr.bf16.mxu0 (!%p414_p2), %v1797_v1  ;;  %1690 = vmatprep.subr.bf16.mxu1 (!%p414_p2), %v1797_v1  ;;  %v822_v49 = vld [vmem:[%s2154_s4] sm:$0xf] (!%p414_p2) }
   0xa   : > { %v476_v11 = vadd.s32 (!%p414_p2), 8, %v1918_v9  ;;  %v481_v13 = vand.u32 (!%p414_p2), 7, %v1918_v9  ;;  %vm636_vm8 = vcmp.lt.s32.totalorder (!%p414_p2), %v1918_v9, 1  ;;  %vm647_vm9 = vcmp.lt.s32.totalorder (!%p414_p2), %v1918_v9, 7  ;;  %v1601_v61 = vld [vmem:[%s2155_s5 + $0x2] ss:$0 sm:$0xff] (!%p414_p2) }
   0xb   : > { %v831_v50 = vsel (!%p414_p2), %vm665_vm2, %v822_v49, 0  ;;  %v1451_v25 = vld [vmem:[%s2162_s12] sm:$0xf] (!%p414_p2) }
   0xc   : > { %v488_v18 = vand.u32 (!%p414_p2), 7, %v476_v11  ;;  %vm1929_vm4 = vcmp.ne.s32.totalorder (!%p414_p2), %v481_v13, 0  ;;  %vm1936_vm5 = vcmp.ne.s32.totalorder (!%p414_p2), %v481_v13, 7  ;;  %v1785_v13 = vld [vmem:[%s2156_s6] sm:$0xff] (!%p414_p2)   ;;  %v1460_v28 = vsel (!%p414_p2), %vm665_vm2, %v1451_v25, 0 }
   0xd   : > { %s2174_s17 = smov (!%p460_p3, %s1583_s17), 3 }
   0xe   : > { %s1584_s20 = sshll.u32 %s2174_s17, 2  ;;  %vm1940_vm7 = vcmp.ne.s32.totalorder %v488_v18, 0  ;;  %vm1946_vm11 = vcmp.ne.s32.totalorder %v488_v18, 7 }
   0xf   : > { %s463_s23 = scalar_lea.vmem %s2150_s0, %s1584_s20  ;;  %s469_s26 = scalar_lea.vmem %s2164_s14, %s1584_s20 }
  0x10   : > { %v1783_v3 = vld [vmem:[%s463_s23] sm:$0xff]  }
  0x11   : > { %1681 = vmatmul.mubr.msk.bf16.vlgmr.msra.gmra.mrb[0].mxu1 %vm523_vm1, %v1783_v3  ;;  %1675 = vmatmul.mubr.msk.bf16.vlgmr.msra.gmra.mrb[0].mxu0 %vm523_vm1, %v1783_v3  ;;  %vm910_vm1 = vcmask 261120  }
  0x12   : > { %1686 = vmatprep.mubr.msk.bf16.mxu0 %vm1798_vm0, %v1797_v1  ;;  %1692 = vmatprep.mubr.msk.bf16.mxu1 %vm1798_vm0, %v1797_v1 }
  0x13   : > { %1685 = vmatpush3.bf16.msra.mxu0 %v667_v5  ;;  %1691 = vmatpush3.bf16.msra.mxu1 %v714_v7 }
  0x14   : > { %1696 = vmatprep.subr.bf16.mxu0 %v1797_v1  ;;  %1702 = vmatprep.subr.bf16.mxu1 %v1797_v1 }
  0xe4   : > { %v621_v12 = vpop.f32.mrb[0].mxu1  ;;  %v1925_v14 = vpop.f32.mrb[0].mxu0 }
  0xe5   : > { %v622_v15 = vadd.f32 %v1593_v10, %v621_v12  ;;  %v1682_v16 = vpop.f32.mrb[1].mxu1  ;;  %v1676_v17 = vpop.f32.mrb[1].mxu0 }
  0xe6   : > { %v624_v19 = vpop.f32.mrb[2].mxu1  ;;  %v1927_v20 = vpop.f32.mrb[2].mxu0  ;;  %v1587_v16 = vld [vmem:[%s2155_s5] ss:$0 sm:$0xff]  ;;  %v1602_v17 = vld [vmem:[%s2155_s5 + $0x3] ss:$0 sm:$0xff] }
  0xe7   : > { %vm628_vm3 = vcmp.gt.f32.partialorder %v622_v15, 0.0  ;;  %v630_v21 = vmul.f32 0.01, %v622_v15  ;;  %v625_v22 = vadd.f32 %v1593_v10, %v624_v19  ;;  %v1683_v23 = vpop.f32.mrb[3].mxu1  ;;  %v1677_v24 = vpop.f32.mrb[3].mxu0  ;;  %v562_v18 = vadd.f32 %v1587_v16, %v1925_v14 }
  0xe8   : > { %v565_v23 = vadd.f32 %v1587_v16, %v1927_v20  ;;  %v1610_v20 = vld [vmem:[%s2157_s7 + $0x4] sm:$0xf] }
  0xe9   : > { %v632_v27 = vsel %vm628_vm3, %v622_v15, %v630_v21  ;;  %vm629_vm6 = vcmp.gt.f32.partialorder %v625_v22, 0.0  ;;  %v631_v29 = vmul.f32 0.01, %v625_v22  ;;  %v1786_v15 = vld [vmem:[%s2156_s6 + $0x8] sm:$0xff]  }
  0xea   : > { %v634_v31 = vrot.slane %v632_v27, 7  ;;  %v645_v35 = vrot.slane %v632_v27, 1 }
  0xeb   : > { %v633_v33 = vsel %vm629_vm6, %v625_v22, %v631_v29 }
  0xec   : > { %v635_v36 = vrot.slane %v633_v33, 7  ;;  %v646_v37 = vrot.slane %v633_v33, 1  ;;  %v658_v38 = vpack.c.bf16 %v633_v33, %v632_v27 }
  0xee   : > { %v637_v39 = vsel %vm636_vm8, %v634_v31, %v635_v36  ;;  %v638_v40 = vsel %vm636_vm8, %v635_v36, %v634_v31  ;;  %v648_v41 = vsel %vm647_vm9, %v645_v35, %v646_v37  ;;  %v649_v42 = vsel %vm647_vm9, %v646_v37, %v645_v35  ;;  %1687 = vmatmul.mubr.msk.bf16.vlgmr.msra.gmra.mrb[4].mxu0 %vm661_vm10, %v658_v38 }
  0xef   : > { %v643_v43 = vsel %vm1929_vm4, %v638_v40, 0.0  ;;  %v644_v44 = vsel %vm1940_vm7, %v637_v39, 0.0  ;;  %v654_v45 = vsel %vm1936_vm5, %v648_v41, 0.0  ;;  %v655_v46 = vsel %vm1946_vm11, %v649_v42, 0.0  ;;  %1697 = vmatpush3.bf16.msra.mxu0 %v764_v34  ;;  %1698 = vmatprep.mubr.msk.bf16.mxu0 %vm1798_vm0, %v1797_v1  ;;  %v974_v40 = vld [vmem:[%s2157_s7] sm:$0xf] }
  0xf0   : > { %v656_v47 = vpack.c.bf16 %v644_v44, %v643_v43  ;;  %v757_v48 = vpack.c.bf16 %v655_v46, %v654_v45  ;;  %1708 = vmatprep.subr.bf16.mxu0 %v1797_v1  ;;  %v1591_v31 = vclamps-f32 %v562_v18, 10.0  ;;  %v1592_v35 = vclamps-f32 %v565_v23, 10.0  ;;  %v1606_v42 = vld [vmem:[%s2159_s9 + $0x1] ss:$0 sm:$0xff] }
  0xf1   : > { %v982_v39 = vsel %vm665_vm2, %v1610_v20, 0  ;;  %v1029_v41 = vsel %vm665_vm2, %v974_v40, 0  ;;  %v1787_v40 = vld [vmem:[%s2160_s10] sm:$0xff]  }
  0xf2   : > { %1693 = vmatmul.mubr.msk.bf16.vlgmr.msra.gmra.mrb[4].mxu1 %vm661_vm10, %v656_v47 }
  0xf3   : > { %1704 = vmatprep.mubr.msk.bf16.mxu1 %vm1798_vm0, %v1797_v1  ;;  %1703 = vmatpush3.bf16.msra.mxu1 %v831_v50  ;;  %v1613_v50 = vld [vmem:[%s2157_s7 + $0x8] sm:$0xf] }
  0xf4   : > { %1716 = vmatprep.subr.bf16.mxu1 %v1797_v1 }
  0xf6   : > { %1699 = vmatmul.mubr.msk.bf16.vlgmr.msra.gmra.mrb[8].mxu0 %vm661_vm10, %v757_v48 }
  0xf7   : > { %1712 = vmatprep.mubr.msk.bf16.mxu0 %vm1798_vm0, %v1797_v1  ;;  %1709 = vmatpush3.bf16.msra.mxu0 %v1785_v13 }
  0xf8   : > { %1710 = vmatprep.subr.bf16.mxu0 %v1797_v1 }
  0xfb   : > { %1711 = vmatpush3.bf16.msra.mxu0 %v1786_v15 }
  0xfc   : > { %1722 = vmatprep.subr.bf16.mxu0 %v1797_v1 }
 0x1c1   : > { %v703_v51 = vpop.f32.mrb[4].mxu0 }
 0x1c2   : > { %v1688_v52 = vpop.f32.mrb[5].mxu0 }
 0x1c3   : > { %v706_v53 = vpop.f32.mrb[6].mxu0 }
 0x1c4   : > { %v1689_v54 = vpop.f32.mrb[7].mxu0 }
 0x1c5   : > { %v750_v55 = vpop.f32.mrb[4].mxu1 }
 0x1c6   : > { %v751_v56 = vadd.f32 %v750_v55, %v703_v51  ;;  %v1694_v57 = vpop.f32.mrb[5].mxu1  ;;  %v1079_v55 = vsel %vm665_vm2, %v1613_v50, 0 }
 0x1c7   : > { %v753_v58 = vpop.f32.mrb[6].mxu1 }
 0x1c8   : > { %v754_v59 = vadd.f32 %v753_v58, %v706_v53  ;;  %v1695_v60 = vpop.f32.mrb[7].mxu1 }
 0x1c9   : > { %v800_v62 = vpop.f32.mrb[8].mxu0 }
 0x1ca   : > { %v807_v63 = vadd.f32 %v800_v62, %v751_v56  ;;  %v1700_v0 = vpop.f32.mrb[9].mxu0 }
 0x1cb   : > { %v803_v2 = vpop.f32.mrb[10].mxu0 }
 0x1cc   : > { %v813_v3 = vadd.f32 %v1601_v61, %v807_v63  ;;  %v808_v4 = vadd.f32 %v803_v2, %v754_v59  ;;  %v1701_v5 = vpop.f32.mrb[11].mxu0 }
 0x1ce   : > { %v817_v6 = vmul.f32 0.01, %v813_v3  ;;  %v814_v7 = vadd.f32 %v1601_v61, %v808_v4  ;;  %vm815_vm12 = vcmp.gt.f32.partialorder %v813_v3, 0.0 }
 0x1d0   : > { %vm816_vm13 = vcmp.gt.f32.partialorder %v814_v7, 0.0  ;;  %v818_v8 = vmul.f32 0.01, %v814_v7  ;;  %v819_v10 = vsel %vm815_vm12, %v813_v3, %v817_v6 }
 0x1d2   : > { %v820_v11 = vsel %vm816_vm13, %v814_v7, %v818_v8  ;;  %v1137_v7 = vld [vmem:[%s2158_s8] sm:$0xf] }
 0x1d3   : > { %v821_v12 = vpack.c.bf16 %v820_v11, %v819_v10  ;;  %v1146_v8 = vsel %vm665_vm2, %v1137_v7, 0 }
 0x1d5   : > { %1705 = vmatmul.mubr.msk.bf16.vlgmr.msra.gmra.mrb[8].mxu1 %vm661_vm10, %v821_v12 }
 0x1d6   : > { %1718 = vmatprep.mubr.msk.bf16.mxu1 %vm1798_vm0, %v1797_v1  ;;  %1717 = vmatpush3.bf16.msra.mxu1 %v982_v39 }
 0x1d7   : > { %1728 = vmatprep.subr.bf16.mxu1 %v1797_v1 }
 0x2a8   : > { %v867_v19 = vpop.f32.mrb[8].mxu1 }
 0x2a9   : > { %v868_v21 = vadd.f32 %v1602_v17, %v867_v19  ;;  %v1706_v22 = vpop.f32.mrb[9].mxu1 }
 0x2aa   : > { %v870_v24 = vpop.f32.mrb[10].mxu1  ;;  %v1615_v22 = vld [vmem:[%s2159_s9 + $0x2] ss:$0 sm:$0xff] }
 0x2ab   : > { %vm874_vm14 = vcmp.gt.f32.partialorder %v868_v21, 0.0  ;;  %v876_v26 = vmul.f32 0.01, %v868_v21  ;;  %v871_v27 = vadd.f32 %v1602_v17, %v870_v24  ;;  %v1707_v29 = vpop.f32.mrb[11].mxu1 }
 0x2ad   : > { %v878_v33 = vsel %vm874_vm14, %v868_v21, %v876_v26  ;;  %vm875_vm15 = vcmp.gt.f32.partialorder %v871_v27, 0.0  ;;  %v877_v34 = vmul.f32 0.01, %v871_v27 }
 0x2ae   : > { %v2004_v36 = vadd.f32 %v1591_v31, %v878_v33 }
 0x2af   : > { %v879_v37 = vsel %vm875_vm15, %v871_v27, %v877_v34 }
 0x2b0   : > { %v2006_v38 = vadd.f32 %v1592_v35, %v879_v37  ;;  %v1604_v50 = vclamps-f32 %v2004_v36, 10.0 }
 0x2b2   : > { %v882_v14 = vpack.c.bf16 %v2006_v38, %v2004_v36  ;;  %v1624_v36 = vld [vmem:[%s2161_s11 + $0x4] sm:$0xf] }
 0x2b4   : > { %1713 = vmatmul.mubr.msk.bf16.vlgmr.msra.gmra.mrb[12].mxu0 %vm910_vm1, %v882_v14 }
 0x2b5   : > { %1724 = vmatprep.mubr.msk.bf16.mxu0 %vm1798_vm0, %v1797_v1  ;;  %1723 = vmatpush3.bf16.msra.mxu0 %v1029_v41  ;;  %v1788_v41 = vld [vmem:[%s2160_s10 + $0x8] sm:$0xff]  }
 0x2b6   : > { %1734 = vmatprep.subr.bf16.mxu0 %v1797_v1 }
 0x387   : > { %v948_v43 = vpop.f32.mrb[12].mxu0 }
 0x388   : > { %v949_v44 = vadd.f32 %v1606_v42, %v948_v43  ;;  %v1714_v45 = vpop.f32.mrb[13].mxu0 }
 0x389   : > { %v951_v46 = vpop.f32.mrb[14].mxu0 }
 0x38a   : > { %vm955_vm3 = vcmp.gt.f32.partialorder %v949_v44, 0.0  ;;  %v957_v47 = vmul.f32 0.01, %v949_v44  ;;  %v952_v48 = vadd.f32 %v1606_v42, %v951_v46  ;;  %v1715_v49 = vpop.f32.mrb[15].mxu0  ;;  %v1616_v42 = vld [vmem:[%s2159_s9 + $0x3] ss:$0 sm:$0xff] }
 0x38c   : > { %v959_v51 = vsel %vm955_vm3, %v949_v44, %v957_v47  ;;  %vm956_vm6 = vcmp.gt.f32.partialorder %v952_v48, 0.0  ;;  %v958_v52 = vmul.f32 0.01, %v952_v48 }
 0x38d   : > { %v961_v53 = vrot.slane %v959_v51, 7  ;;  %v967_v56 = vrot.slane %v959_v51, 1 }
 0x38e   : > { %v960_v54 = vsel %vm956_vm6, %v952_v48, %v958_v52 }
 0x38f   : > { %v962_v57 = vrot.slane %v960_v54, 7  ;;  %v968_v58 = vrot.slane %v960_v54, 1  ;;  %v975_v59 = vpack.c.bf16 %v960_v54, %v959_v51  ;;  %v1605_v54 = vclamps-f32 %v2006_v38, 10.0  ;;  %v1288_v38 = vld [vmem:[%s2161_s11] sm:$0xf] }
 0x391   : > { %v963_v60 = vsel %vm636_vm8, %v961_v53, %v962_v57  ;;  %v964_v61 = vsel %vm636_vm8, %v962_v57, %v961_v53  ;;  %v969_v62 = vsel %vm647_vm9, %v967_v56, %v968_v58  ;;  %v970_v63 = vsel %vm647_vm9, %v968_v58, %v967_v56  ;;  %1719 = vmatmul.mubr.msk.bf16.vlgmr.msra.gmra.mrb[12].mxu1 %vm661_vm10, %v975_v59 }
 0x392   : > { %v965_v0 = vsel %vm1929_vm4, %v964_v61, 0.0  ;;  %v966_v2 = vsel %vm1940_vm7, %v963_v60, 0.0  ;;  %v971_v3 = vsel %vm1936_vm5, %v969_v62, 0.0  ;;  %v972_v4 = vsel %vm1946_vm11, %v970_v63, 0.0  ;;  %1729 = vmatpush3.bf16.msra.mxu1 %v1079_v55  ;;  %1730 = vmatprep.mubr.msk.bf16.mxu1 %vm1798_vm0, %v1797_v1  ;;  %v1620_v60 = vld [vmem:[%s2163_s13 + $0x1] ss:$0 sm:$0xff] }
 0x393   : > { %v973_v5 = vpack.c.bf16 %v966_v2, %v965_v0  ;;  %v1072_v6 = vpack.c.bf16 %v972_v4, %v971_v3  ;;  %1740 = vmatprep.subr.bf16.mxu1 %v1797_v1  ;;  %v1296_v58 = vsel %vm665_vm2, %v1624_v36, 0  ;;  %v1343_v59 = vsel %vm665_vm2, %v1288_v38, 0 }
 0x395   : > { %1725 = vmatmul.mubr.msk.bf16.vlgmr.msra.gmra.mrb[16].mxu0 %vm661_vm10, %v973_v5  ;;  %v1627_v5 = vld [vmem:[%s2161_s11 + $0x8] sm:$0xf] }
 0x396   : > { %1736 = vmatprep.mubr.msk.bf16.mxu0 %vm1798_vm0, %v1797_v1  ;;  %1735 = vmatpush3.bf16.msra.mxu0 %v1146_v8 }
 0x397   : > { %1748 = vmatprep.subr.bf16.mxu0 %v1797_v1 }
 0x399   : > { %1731 = vmatmul.mubr.msk.bf16.vlgmr.msra.gmra.mrb[16].mxu1 %vm661_vm10, %v1072_v6 }
 0x39a   : > { %1744 = vmatprep.mubr.msk.bf16.mxu1 %vm1798_vm0, %v1797_v1  ;;  %1741 = vmatpush3.bf16.msra.mxu1 %v1787_v40 }
 0x39b   : > { %1742 = vmatprep.subr.bf16.mxu1 %v1797_v1 }
 0x39e   : > { %1743 = vmatpush3.bf16.msra.mxu1 %v1788_v41 }
 0x39f   : > { %1754 = vmatprep.subr.bf16.mxu1 %v1797_v1 }
 0x464   : > { %v1018_v10 = vpop.f32.mrb[12].mxu1 }
 0x465   : > { %v1720_v11 = vpop.f32.mrb[13].mxu1 }
 0x466   : > { %v1021_v12 = vpop.f32.mrb[14].mxu1  ;;  %v1393_v11 = vsel %vm665_vm2, %v1627_v5, 0 }
 0x467   : > { %v1721_v13 = vpop.f32.mrb[15].mxu1 }
 0x468   : > { %v1065_v15 = vpop.f32.mrb[16].mxu0 }
 0x469   : > { %v1066_v16 = vadd.f32 %v1065_v15, %v1018_v10  ;;  %v1726_v17 = vpop.f32.mrb[17].mxu0 }
 0x46a   : > { %v1068_v18 = vpop.f32.mrb[18].mxu0 }
 0x46b   : > { %v1069_v19 = vadd.f32 %v1068_v18, %v1021_v12  ;;  %v1727_v21 = vpop.f32.mrb[19].mxu0 }
 0x46c   : > { %v1115_v23 = vpop.f32.mrb[16].mxu1 }
 0x46d   : > { %v1122_v24 = vadd.f32 %v1115_v23, %v1066_v16  ;;  %v1732_v26 = vpop.f32.mrb[17].mxu1 }
 0x46e   : > { %v1118_v27 = vpop.f32.mrb[18].mxu1 }
 0x46f   : > { %v1128_v29 = vadd.f32 %v1615_v22, %v1122_v24  ;;  %v1123_v31 = vadd.f32 %v1118_v27, %v1069_v19  ;;  %v1733_v33 = vpop.f32.mrb[19].mxu1 }
 0x471   : > { %v1132_v34 = vmul.f32 0.01, %v1128_v29  ;;  %v1129_v35 = vadd.f32 %v1615_v22, %v1123_v31  ;;  %vm1130_vm12 = vcmp.gt.f32.partialorder %v1128_v29, 0.0 }
 0x473   : > { %vm1131_vm13 = vcmp.gt.f32.partialorder %v1129_v35, 0.0  ;;  %v1133_v37 = vmul.f32 0.01, %v1129_v35  ;;  %v1134_v14 = vsel %vm1130_vm12, %v1128_v29, %v1132_v34 }
 0x475   : > { %v1135_v20 = vsel %vm1131_vm13, %v1129_v35, %v1133_v37 }
 0x476   : > { %v1136_v39 = vpack.c.bf16 %v1135_v20, %v1134_v14 }
 0x478   : > { %1737 = vmatmul.mubr.msk.bf16.vlgmr.msra.gmra.mrb[20].mxu0 %vm661_vm10, %v1136_v39 }
 0x479   : > { %1750 = vmatprep.mubr.msk.bf16.mxu0 %vm1798_vm0, %v1797_v1  ;;  %1749 = vmatpush3.bf16.msra.mxu0 %v1296_v58 }
 0x47a   : > { %1760 = vmatprep.subr.bf16.mxu0 %v1797_v1 }
 0x54b   : > { %v1182_v43 = vpop.f32.mrb[20].mxu0 }
 0x54c   : > { %v1183_v44 = vadd.f32 %v1616_v42, %v1182_v43  ;;  %v1738_v45 = vpop.f32.mrb[21].mxu0 }
 0x54d   : > { %v1185_v46 = vpop.f32.mrb[22].mxu0 }
 0x54e   : > { %vm1189_vm14 = vcmp.gt.f32.partialorder %v1183_v44, 0.0  ;;  %v1191_v47 = vmul.f32 0.01, %v1183_v44  ;;  %v1186_v48 = vadd.f32 %v1616_v42, %v1185_v46  ;;  %v1739_v49 = vpop.f32.mrb[23].mxu0 }
 0x550   : > { %v1193_v51 = vsel %vm1189_vm14, %v1183_v44, %v1191_v47  ;;  %vm1190_vm15 = vcmp.gt.f32.partialorder %v1186_v48, 0.0  ;;  %v1192_v52 = vmul.f32 0.01, %v1186_v48 }
 0x551   : > { %v2079_v53 = vadd.f32 %v1604_v50, %v1193_v51 }
 0x552   : > { %v1194_v55 = vsel %vm1190_vm15, %v1186_v48, %v1192_v52  ;;  %v1630_v52 = vld [vmem:[%s2163_s13 + $0x3] ss:$0 sm:$0xff] }
 0x553   : > { %v2082_v56 = vadd.f32 %v1605_v54, %v1194_v55 }
 0x555   : > { %v1197_v57 = vpack.c.bf16 %v2082_v56, %v2079_v53 }
 0x557   : > { %1745 = vmatmul.mubr.msk.bf16.vlgmr.msra.gmra.mrb[20].mxu1 %vm910_vm1, %v1197_v57 }
 0x558   : > { %1756 = vmatprep.mubr.msk.bf16.mxu1 %vm1798_vm0, %v1797_v1  ;;  %1755 = vmatpush3.bf16.msra.mxu1 %v1343_v59 }
 0x559   : > { %1766 = vmatprep.subr.bf16.mxu1 %v1797_v1 }
 0x62a   : > { %v1262_v61 = vpop.f32.mrb[20].mxu1 }
 0x62b   : > { %v1263_v62 = vadd.f32 %v1620_v60, %v1262_v61  ;;  %v1746_v63 = vpop.f32.mrb[21].mxu1 }
 0x62c   : > { %v1265_v0 = vpop.f32.mrb[22].mxu1 }
 0x62d   : > { %vm1269_vm1 = vcmp.gt.f32.partialorder %v1263_v62, 0.0  ;;  %v1271_v2 = vmul.f32 0.01, %v1263_v62  ;;  %v1266_v3 = vadd.f32 %v1620_v60, %v1265_v0  ;;  %v1747_v4 = vpop.f32.mrb[23].mxu1  ;;  %v1618_v60 = vclamps-f32 %v2079_v53, 10.0 }
 0x62e   : > { %v1619_v0 = vclamps-f32 %v2082_v56, 10.0 }
 0x62f   : > { %v1273_v6 = vsel %vm1269_vm1, %v1263_v62, %v1271_v2  ;;  %vm1270_vm3 = vcmp.gt.f32.partialorder %v1266_v3, 0.0  ;;  %v1272_v7 = vmul.f32 0.01, %v1266_v3 }
 0x630   : > { %v1275_v8 = vrot.slane %v1273_v6, 7  ;;  %v1281_v12 = vrot.slane %v1273_v6, 1 }
 0x631   : > { %v1274_v10 = vsel %vm1270_vm3, %v1266_v3, %v1272_v7 }
 0x632   : > { %v1276_v13 = vrot.slane %v1274_v10, 7  ;;  %v1282_v15 = vrot.slane %v1274_v10, 1  ;;  %v1289_v16 = vpack.c.bf16 %v1274_v10, %v1273_v6 }
 0x634   : > { %v1277_v17 = vsel %vm636_vm8, %v1275_v8, %v1276_v13  ;;  %v1278_v18 = vsel %vm636_vm8, %v1276_v13, %v1275_v8  ;;  %v1283_v19 = vsel %vm647_vm9, %v1281_v12, %v1282_v15  ;;  %v1284_v21 = vsel %vm647_vm9, %v1282_v15, %v1281_v12  ;;  %1751 = vmatmul.mubr.msk.bf16.vlgmr.msra.gmra.mrb[24].mxu0 %vm661_vm10, %v1289_v16 }
 0x635   : > { %v1279_v22 = vsel %vm1929_vm4, %v1278_v18, 0.0  ;;  %v1280_v23 = vsel %vm1940_vm7, %v1277_v17, 0.0  ;;  %v1285_v24 = vsel %vm1936_vm5, %v1283_v19, 0.0  ;;  %v1286_v26 = vsel %vm1946_vm11, %v1284_v21, 0.0  ;;  %1761 = vmatpush3.bf16.msra.mxu0 %v1393_v11  ;;  %1762 = vmatprep.mubr.msk.bf16.mxu0 %vm1798_vm0, %v1797_v1 }
 0x636   : > { %v1287_v9 = vpack.c.bf16 %v1280_v23, %v1279_v22  ;;  %v1386_v27 = vpack.c.bf16 %v1286_v26, %v1285_v24  ;;  %vm1519_vm7 = vcmask 257024  }
 0x638   : > { %1757 = vmatmul.mubr.msk.bf16.vlgmr.msra.gmra.mrb[24].mxu1 %vm661_vm10, %v1287_v9 }
 0x639   : > { %1768 = vmatprep.mubr.msk.bf16.mxu1 %vm1798_vm0, %v1797_v1  ;;  %1767 = vmatpush3.bf16.msra.mxu1 %v1460_v28  ;;  %v1629_v1 = vld [vmem:[%s2163_s13 + $0x2] ss:$0 sm:$0xff] }
 0x63c   : > { %1763 = vmatmul.mubr.msk.bf16.vlgmr.msra.gmra.mrb[28].mxu0 %vm661_vm10, %v1386_v27 }
 0x707   : > { %v1332_v30 = vpop.f32.mrb[24].mxu0 }
 0x708   : > { %v1752_v32 = vpop.f32.mrb[25].mxu0 }
 0x709   : > { %v1335_v29 = vpop.f32.mrb[26].mxu0 }
 0x70a   : > { %v1753_v31 = vpop.f32.mrb[27].mxu0 }
 0x70b   : > { %v1379_v33 = vpop.f32.mrb[24].mxu1 }
 0x70c   : > { %v1380_v34 = vadd.f32 %v1379_v33, %v1332_v30  ;;  %v1758_v35 = vpop.f32.mrb[25].mxu1 }
 0x70d   : > { %v1382_v37 = vpop.f32.mrb[26].mxu1 }
 0x70e   : > { %v1383_v14 = vadd.f32 %v1382_v37, %v1335_v29  ;;  %v1759_v20 = vpop.f32.mrb[27].mxu1 }
 0x70f   : > { %v1429_v39 = vpop.f32.mrb[28].mxu0 }
 0x710   : > { %v1436_v40 = vadd.f32 %v1429_v39, %v1380_v34  ;;  %v1764_v41 = vpop.f32.mrb[29].mxu0 }
 0x711   : > { %v1432_v42 = vpop.f32.mrb[30].mxu0 }
 0x712   : > { %v1442_v43 = vadd.f32 %v1629_v1, %v1436_v40  ;;  %v1437_v44 = vadd.f32 %v1432_v42, %v1383_v14  ;;  %v1765_v45 = vpop.f32.mrb[31].mxu0 }
 0x714   : > { %v1446_v46 = vmul.f32 0.01, %v1442_v43  ;;  %v1443_v47 = vadd.f32 %v1629_v1, %v1437_v44  ;;  %vm1444_vm0 = vcmp.gt.f32.partialorder %v1442_v43, 0.0 }
 0x716   : > { %vm1445_vm2 = vcmp.gt.f32.partialorder %v1443_v47, 0.0  ;;  %v1447_v48 = vmul.f32 0.01, %v1443_v47  ;;  %v1448_v49 = vsel %vm1444_vm0, %v1442_v43, %v1446_v46 }
 0x718   : > { %v1449_v50 = vsel %vm1445_vm2, %v1443_v47, %v1447_v48 }
 0x719   : > { %v1450_v51 = vpack.c.bf16 %v1449_v50, %v1448_v49 }
 0x71b   : > { %1769 = vmatmul.mubr.msk.bf16.vlgmr.msra.gmra.mrb[28].mxu1 %vm661_vm10, %v1450_v51 }
 0x7ee   : > { %v1496_v54 = vpop.f32.mrb[28].mxu1 }
 0x7ef   : > { %v1497_v55 = vadd.f32 %v1630_v52, %v1496_v54  ;;  %v1770_v57 = vpop.f32.mrb[29].mxu1 }
 0x7f0   : > { %v1499_v36 = vpop.f32.mrb[30].mxu1 }
 0x7f1   : > { %vm1503_vm4 = vcmp.gt.f32.partialorder %v1497_v55, 0.0  ;;  %v1505_v58 = vmul.f32 0.01, %v1497_v55  ;;  %v1500_v38 = vadd.f32 %v1630_v52, %v1499_v36  ;;  %v1771_v59 = vpop.f32.mrb[31].mxu1 }
 0x7f3   : > { %v1507_v61 = vsel %vm1503_vm4, %v1497_v55, %v1505_v58  ;;  %vm1504_vm5 = vcmp.gt.f32.partialorder %v1500_v38, 0.0  ;;  %v1506_v62 = vmul.f32 0.01, %v1500_v38 }
 0x7f4   : > { %v1509_v63 = vadd.f32 %v1618_v60, %v1507_v61 }
 0x7f5   : > { %v1508_v2 = vsel %vm1504_vm5, %v1500_v38, %v1506_v62 }
 0x7f6   : > { %v1636_v3 = vpack.c.bf16 %v1509_v63, %v1509_v63  ;;  %v1510_v4 = vadd.f32 %v1619_v0, %v1508_v2 }
 0x7f8   : > { %1520 = vst.msk [vmem:[%s469_s26] sm:$0xf] %vm1519_vm7, %v1636_v3  ;;  %v1637_v5 = vpack.c.bf16 %v1510_v4, %v1510_v4 }
 0x7fa   : > { %1521 = vst.msk [vmem:[%s469_s26 + $0x4] sm:$0xf] %vm1519_vm7, %v1637_v5 }
 0x7fb PF: > { %s24_s29 = sadd.s32 1, %s1795_s29  }
 0x7fc   : > { %p21_p4 = scmp.ge.s32.totalorder %s24_s29, 4  }
 0x7fe   :  { %23 = sbr.rel (!%p21_p4) target bundleno = 1 (0x1), region = 112 }

</bundles_post_ra>
